<compile_context>
chip_gen: v5e
topology: v5e:2x2
jax: 0.10.0
libtpu: 0.0.40
codegen_flags: <defaults>
</compile_context>

<pallas_src>
import jax
import jax.numpy as jnp
import numpy as np
from jax.experimental import pallas as pl
from jax.experimental.pallas import tpu as pltpu

# ---------------- configuration (small synthetic shapes) ----------------
L, B, D, H = 8, 2, 32, 4           # seq, batch, hidden, heads
LB = L * B                         # batches folded into the sublane axis
DK = D // 2                        # 16  q/k projection width
DV = D                             # 32  v/g projection width
HK = DK // H                       # 4   head_dk
HV = DV // H                       # 8   head_dv
HALF = HK // 2                     # 2   rotary half width
PER_HEAD = 2 * HK + HV             # 16  [q_h | k_h | v_h] lanes per head
RATIO = 2                          # router slots
DCONV = 2
EPS = 1e-5
ROPE_BASE = 10000.0
SCALE = HK ** -0.5
BF16 = jnp.bfloat16


# ---------------- fused kernel ----------------
def fused_kernel(x_ref, cw_ref, w_ref, wo_ref, rw_ref, rope_ref, mask_ref, y_ref):
    """conv + proj + rotary + routed attention + group-norm + gate + out-proj.

    Runs once (no grid); row f of every (LB, ...) tensor is (pos=f//B, batch=f%B).
    """
    x = x_ref[...]                                            # (LB, D) f32

    # causal depthwise conv1d (kernel=2, groups=D, no bias) + silu; the shifted
    # row comes from the same batch (f - B) and pos 0 rows are zero-padded.
    row = jax.lax.broadcasted_iota(jnp.int32, (LB, D), 0)
    x_prev = jnp.where(row < B, 0.0, pltpu.roll(x, shift=B, axis=0))
    cw = cw_ref[...]                                          # (2, D)
    xc = jax.nn.silu(x_prev * cw[0:1, :] + x * cw[1:2, :])

    # fused q/k/v/g projection: ONE bf16 MXU push, f32 accumulation.
    proj = jnp.dot(xc.astype(BF16), w_ref[...],
                   preferred_element_type=jnp.float32)        # (LB, H*PER_HEAD + DV)

    # weights are packed head-major in the wrapper -> a single stack splits all
    # heads; q/k/v are then cheap last-axis lane slices of the stacked tensor.
    qkv = jnp.stack([proj[:, h * PER_HEAD:(h + 1) * PER_HEAD] for h in range(H)],
                    axis=0)                                   # (H, LB, PER_HEAD)
    g = proj[:, H * PER_HEAD:]                                # (LB, DV)

    qh = jax.nn.silu(qkv[..., :HK])                           # (H, LB, HK) f32
    kh = qkv[..., HK:2 * HK]
    vh = qkv[..., 2 * HK:]                                    # (H, LB, HV) f32

    # rotary (GPT-NeoX, non-interleaved), explicit VPU form shared by all heads.
    cos = rope_ref[:, :HALF][None]                            # (1, LB, HALF)
    sin = rope_ref[:, HALF:][None]

    def rope(t):
        t1, t2 = t[..., :HALF], t[..., HALF:]
        return jnp.concatenate([t1 * cos - t2 * sin, t2 * cos + t1 * sin], axis=-1)

    rq, rk = rope(qh), rope(kh)                               # (H, LB, HK) f32

    # router: softmax over RATIO slots + first-occurrence top-1 -- kept in f32
    # so slot selection cannot flip under the bf16 matmul casts elsewhere.
    logits = jnp.einsum('hld,hdr->hlr', vh, rw_ref[...],
                        preferred_element_type=jnp.float32)   # (H, LB, R)
    scores = jax.nn.softmax(logits, axis=-1)
    max_score = jnp.max(scores, axis=-1, keepdims=True)
    r_pos = jax.lax.broadcasted_iota(jnp.int32, scores.shape, 2).astype(jnp.float32)
    cand = jnp.where(scores >= max_score, r_pos, float(RATIO))
    onehot = (r_pos == jnp.min(cand, axis=-1, keepdims=True)).astype(jnp.float32)

    # inclusive per-batch running count of slot usage (exact small integers).
    # TODO(synk): at realistic L keep these counts in a VMEM accumulator across
    # kv tiles instead of this O(H*L^2) bookkeeping matmul.
    mask = mask_ref[...]                                      # (LB, LB) block-diag tril
    sum_idx = jnp.einsum('hlm,hmr->hlr', jnp.broadcast_to(mask, (H, LB, LB)),
                         onehot, preferred_element_type=jnp.float32)
    norm = jnp.where(sum_idx > 0.0, 1.0 / jnp.maximum(sum_idx, 1.0), 0.0)
    wq_gate = onehot * max_score * norm                       # (H, LB, R)

    # routed attention via the module's own (r d) expansion: the score matrix is
    # ONE head-batched K=RATIO*HK einsum (rotary + routing gate folded in).
    q_exp = jnp.concatenate([rq * wq_gate[..., 0:1], rq * wq_gate[..., 1:2]],
                            axis=-1).astype(BF16)             # (H, LB, RATIO*HK)
    k_exp = jnp.concatenate([rk * onehot[..., 0:1], rk * onehot[..., 1:2]],
                            axis=-1).astype(BF16)
    qk = jnp.einsum('hld,hmd->hlm', q_exp, k_exp,
                    preferred_element_type=jnp.float32) * SCALE * mask[None]
    o = jnp.einsum('hlm,hmd->hld', qk.astype(BF16), vh.astype(BF16),
                   preferred_element_type=jnp.float32)        # (H, LB, HV)

    # group_norm = LayerNorm(head_dv, eps=1e-5, no affine), per head, f32.
    mu = jnp.mean(o, axis=-1, keepdims=True)
    var = jnp.mean((o - mu) ** 2, axis=-1, keepdims=True)
    o = (o - mu) * jax.lax.rsqrt(var + EPS)

    # merge heads, output gate, output projection (bf16 MXU, f32 accumulation).
    o_merged = jnp.concatenate([o[h] for h in range(H)], axis=-1)     # (LB, DV)
    y_ref[...] = jnp.dot((jax.nn.silu(g) * o_merged).astype(BF16), wo_ref[...],
                         preferred_element_type=jnp.float32)
    # TODO(synk): for realistic L/D -- tile the kv axis as an 'arbitrary' grid dim
    # with VMEM accumulators + pl.when init/finalise (never materialise (H,L,L)),
    # size tiles for v7x's 64 MiB VMEM via pltpu.CompilerParams(vmem_limit_bytes),
    # keep grid=(B, L//tq) 'parallel' so v7x's two TensorCores split the work, and
    # present the output slab with a multiple-of-128 last dim for unmasked stores.
    # MXU K stays underfilled (HK=4 / HV=8) unless the head dims themselves grow.


# ---------------- wrapper ----------------
def rotary_tables(l, hk):
    inv_freq = 1.0 / (ROPE_BASE ** (jnp.arange(0, hk, 2, dtype=jnp.float32) / hk))
    freqs = jnp.outer(jnp.arange(l, dtype=jnp.float32), inv_freq)
    return jnp.cos(freqs), jnp.sin(freqs)                     # (L, HALF) each


def mom_attention_forward(x_lbd, p):
    """x_lbd: (seq, batch, hidden), same layout as the PyTorch module."""
    l, b, d = x_lbd.shape
    assert (l, b, d) == (L, B, D)

    # (L, B, D) -> (L*B, D) is a free bitcast view (no transpose / HBM copy);
    # flat row f corresponds to (pos = f // B, batch = f % B).
    x_flat = x_lbd.reshape(l * b, d)

    # host-side constant tables (no in-kernel integer div/mod needed)
    cos, sin = rotary_tables(l, HK)
    rope = jnp.repeat(jnp.concatenate([cos, sin], axis=-1), b, axis=0)   # (LB, 2*HALF)
    f = jnp.arange(l * b)
    mask = ((f[None, :] // b <= f[:, None] // b) &
            (f[None, :] % b == f[:, None] % b)).astype(jnp.float32)      # (LB, LB)

    # pack projection weights head-major ([q_h|k_h|v_h] per head, then g) so one
    # stack inside the kernel splits every head; cast once to bf16 (half the DMA).
    blocks = []
    for h in range(H):
        blocks += [p["wq"][:, h * HK:(h + 1) * HK],
                   p["wk"][:, h * HK:(h + 1) * HK],
                   p["wv"][:, h * HV:(h + 1) * HV]]
    blocks.append(p["wg"])
    w_all = jnp.concatenate(blocks, axis=1).astype(BF16)      # (D, H*PER_HEAD + DV)
    wo = p["wo"].astype(BF16)                                 # (DV, D)

    # single invocation, no grid: the whole problem is one VMEM-resident block,
    # so there is no per-grid-step overhead (matters on single-TC v5e/v6e).
    y_flat = pl.pallas_call(
        fused_kernel,
        out_shape=jax.ShapeDtypeStruct((l * b, d), jnp.float32),
    )(x_flat, p["conv_w"], w_all, wo, p["router"], rope, mask)

    y = y_flat.reshape(l, b, d)                               # bitcast back to (L, B, D)
    # TODO(synk): hidden_states / conv_states are inference-time stateful cache
    # paths (causal_conv1d_update); the training-mode forward returns them as None.
    return y, None, None


# ---------------- deterministic parameter init ----------------
def init_params(key):
    ks = jax.random.split(key, 7)

    def uni(k, fan_in, shape):
        bound = 1.0 / float(np.sqrt(fan_in))
        return jax.random.uniform(k, shape, jnp.float32, -bound, bound)

    return {
        "wq": uni(ks[0], D, (D, DK)),              # stored as (in, out) = W^T
        "wk": uni(ks[1], D, (D, DK)),
        "wv": uni(ks[2], D, (D, DV)),
        "wg": uni(ks[3], D, (D, DV)),
        "wo": uni(ks[4], DV, (DV, D)),
        "conv_w": uni(ks[5], DCONV, (DCONV, D)),   # row 0: weight for x[t-1], row 1: x[t]
        "router": uni(ks[6], HV, (H, HV, RATIO)),  # kaiming-uniform-style
    }


# ---------------- pure-JAX reference (explicit (r d) expansion) ----------------
def ref_forward(x_lbd, p):
    """Mirror of the PyTorch module with the same bf16-operand / f32-accumulate
    cast points as the kernel (so top-1 slot selection is deterministic)."""
    x = jnp.transpose(x_lbd, (1, 0, 2))                       # (B, L, D)
    b, l, d = x.shape
    x_prev = jnp.concatenate([jnp.zeros((b, 1, d), x.dtype), x[:, :-1, :]], axis=1)
    xc = jax.nn.silu(x_prev * p["conv_w"][0][None, None, :]
                     + x * p["conv_w"][1][None, None, :])
    xcb = xc.astype(BF16)

    def mm(a, w):
        return jnp.dot(a, w.astype(BF16), preferred_element_type=jnp.float32)

    q = jax.nn.silu(mm(xcb, p["wq"]))
    k = mm(xcb, p["wk"])
    v = mm(xcb, p["wv"])
    g = mm(xcb, p["wg"])

    def heads(t, hd):
        return t.reshape(b, l, H, hd).transpose(0, 2, 1, 3)

    q, k, v4 = heads(q, HK), heads(k, HK), heads(v, HV)
    cos, sin = rotary_tables(l, HK)

    def rot(t):
        t1, t2 = t[..., :HALF], t[..., HALF:]
        return jnp.concatenate([t1 * cos - t2 * sin, t2 * cos + t1 * sin], axis=-1)

    q, k = rot(q), rot(k)
    logits = jnp.einsum("bhld,hdr->bhlr", v4, p["router"])    # f32 router path
    scores = jax.nn.softmax(logits, axis=-1)
    onehot = jax.nn.one_hot(jnp.argmax(scores, axis=-1), RATIO, dtype=jnp.float32)
    masked_scores = onehot * jnp.max(scores, axis=-1, keepdims=True)
    sum_indices = jnp.cumsum(onehot, axis=2)
    norm = jnp.where(sum_indices == 0, 0.0,
                     1.0 / jnp.maximum(sum_indices, 1.0))[..., None]
    q_exp = (jnp.einsum("bhld,bhlr->bhlrd", q, masked_scores) * norm
             ).reshape(b, H, l, RATIO * HK)
    k_exp = jnp.einsum("bhld,bhlr->bhlrd", k, onehot).reshape(b, H, l, RATIO * HK)
    qk = jnp.einsum("bhld,bhmd->bhlm", q_exp.astype(BF16), k_exp.astype(BF16),
                    preferred_element_type=jnp.float32) * SCALE
    qk = qk * jnp.tril(jnp.ones((l, l), jnp.float32))
    o = jnp.einsum("bhlm,bhmd->bhld", qk.astype(BF16), v4.astype(BF16),
                   preferred_element_type=jnp.float32).transpose(0, 2, 1, 3)
    mu = o.mean(-1, keepdims=True)
    var = ((o - mu) ** 2).mean(-1, keepdims=True)
    o = ((o - mu) * jax.lax.rsqrt(var + EPS)).reshape(b, l, d)
    y = jnp.dot((jax.nn.silu(g) * o).astype(BF16), p["wo"].astype(BF16),
                preferred_element_type=jnp.float32)
    return jnp.transpose(y, (1, 0, 2))


if __name__ == "__main__":
    key = jax.random.PRNGKey(0)
    kx, kp = jax.random.split(key)
    x = jax.random.normal(kx, (L, B, D), jnp.float32)          # (seq, batch, hidden)
    params = init_params(kp)

    y, _, _ = mom_attention_forward(x, params)
    y = jax.block_until_ready(y)
    assert y.shape == (L, B, D)

    y_ref = ref_forward(x, params)
    # tolerance sized for bf16 MXU operands with f32 accumulation on both sides
    np.testing.assert_allclose(np.asarray(y), np.asarray(y_ref), rtol=1e-2, atol=1e-2)
    print("KERNEL_OK")
</pallas_src>

<mosaic_0001>
module attributes {stable_mosaic.version = 11 : i64} {
  func.func @fused_kernel(%arg0: memref<16x32xf32, #tpu.memory_space<vmem>>, %arg1: memref<2x32xf32, #tpu.memory_space<vmem>>, %arg2: memref<32x96xbf16, #tpu.memory_space<vmem>>, %arg3: memref<32x32xbf16, #tpu.memory_space<vmem>>, %arg4: memref<4x8x2xf32, #tpu.memory_space<vmem>>, %arg5: memref<16x4xf32, #tpu.memory_space<vmem>>, %arg6: memref<16x16xf32, #tpu.memory_space<vmem>>, %arg7: memref<16x32xf32, #tpu.memory_space<vmem>>) attributes {dimension_semantics = [], scalar_prefetch = 0 : i64, scratch_operands = 0 : i64, tpu.core_type = #tpu.core_type<tc>} {
    %c0 = arith.constant 0 : index
    %c0_0 = arith.constant 0 : index
    %0 = vector.load %arg0[%c0, %c0_0] : memref<16x32xf32, #tpu.memory_space<vmem>>, vector<16x32xf32>
    %1 = tpu.iota {dimensions = array<i32: 0>} : vector<16x32xi32>
    %c2_i32 = arith.constant 2 : i32
    %2 = vector.broadcast %c2_i32 : i32 to vector<16x32xi32>
    %3 = arith.cmpi slt, %1, %2 : vector<16x32xi32>
    %c2_i32_1 = arith.constant 2 : i32
    %4 = tpu.dynamic_rotate %0 by %c2_i32_1 dim 0 : vector<16x32xf32>, i32 -> vector<16x32xf32>
    %cst = arith.constant 0.000000e+00 : f32
    %5 = vector.broadcast %cst : f32 to vector<16x32xf32>
    %6 = arith.select %3, %5, %4 : vector<16x32xi1>, vector<16x32xf32>
    %c0_2 = arith.constant 0 : index
    %c0_3 = arith.constant 0 : index
    %7 = vector.load %arg1[%c0_2, %c0_3] : memref<2x32xf32, #tpu.memory_space<vmem>>, vector<2x32xf32>
    %8 = vector.extract_strided_slice %7 {offsets = [0, 0], sizes = [1, 32], strides = [1, 1]} : vector<2x32xf32> to vector<1x32xf32>
    %9 = vector.broadcast %8 : vector<1x32xf32> to vector<16x32xf32>
    %10 = arith.mulf %6, %9 : vector<16x32xf32>
    %11 = vector.extract_strided_slice %7 {offsets = [1, 0], sizes = [1, 32], strides = [1, 1]} : vector<2x32xf32> to vector<1x32xf32>
    %12 = vector.broadcast %11 : vector<1x32xf32> to vector<16x32xf32>
    %13 = arith.mulf %0, %12 : vector<16x32xf32>
    %14 = arith.addf %10, %13 : vector<16x32xf32>
    %15 = arith.negf %14 : vector<16x32xf32>
    %16 = math.exp %15 : vector<16x32xf32>
    %cst_4 = arith.constant 1.000000e+00 : f32
    %17 = vector.broadcast %cst_4 : f32 to vector<16x32xf32>
    %18 = arith.addf %17, %16 : vector<16x32xf32>
    %19 = arith.divf %17, %18 : vector<16x32xf32>
    %20 = arith.mulf %14, %19 : vector<16x32xf32>
    %21 = arith.truncf %20 : vector<16x32xf32> to vector<16x32xbf16>
    %c0_5 = arith.constant 0 : index
    %c0_6 = arith.constant 0 : index
    %22 = vector.load %arg2[%c0_5, %c0_6] : memref<32x96xbf16, #tpu.memory_space<vmem>>, vector<32x96xbf16>
    %cst_7 = arith.constant dense<0.000000e+00> : vector<16x96xf32>
    %23 = tpu.matmul %21, %22, %cst_7 {dimension_numbers = #tpu.dot_dimension_numbers<[1], [0], [0], [1], [0, 0, 1, 1], [], []>} : vector<16x32xbf16>, vector<32x96xbf16>, vector<16x96xf32> -> vector<16x96xf32>
    %24 = vector.extract_strided_slice %23 {offsets = [0, 0], sizes = [16, 16], strides = [1, 1]} : vector<16x96xf32> to vector<16x16xf32>
    %25 = vector.extract_strided_slice %23 {offsets = [0, 16], sizes = [16, 16], strides = [1, 1]} : vector<16x96xf32> to vector<16x16xf32>
    %26 = vector.extract_strided_slice %23 {offsets = [0, 32], sizes = [16, 16], strides = [1, 1]} : vector<16x96xf32> to vector<16x16xf32>
    %27 = vector.extract_strided_slice %23 {offsets = [0, 48], sizes = [16, 16], strides = [1, 1]} : vector<16x96xf32> to vector<16x16xf32>
    %28 = vector.shape_cast %24 : vector<16x16xf32> to vector<1x16x16xf32>
    %29 = vector.shape_cast %25 : vector<16x16xf32> to vector<1x16x16xf32>
    %30 = vector.shape_cast %26 : vector<16x16xf32> to vector<1x16x16xf32>
    %31 = vector.shape_cast %27 : vector<16x16xf32> to vector<1x16x16xf32>
    %32 = tpu.concatenate %28, %29, %30, %31 in 0 : vector<1x16x16xf32>, vector<1x16x16xf32>, vector<1x16x16xf32>, vector<1x16x16xf32> -> vector<4x16x16xf32>
    %33 = vector.extract_strided_slice %23 {offsets = [0, 64], sizes = [16, 32], strides = [1, 1]} : vector<16x96xf32> to vector<16x32xf32>
    %34 = vector.extract_strided_slice %32 {offsets = [0, 0, 0], sizes = [4, 16, 4], strides = [1, 1, 1]} : vector<4x16x16xf32> to vector<4x16x4xf32>
    %35 = arith.negf %34 : vector<4x16x4xf32>
    %36 = math.exp %35 : vector<4x16x4xf32>
    %cst_8 = arith.constant 1.000000e+00 : f32
    %37 = vector.broadcast %cst_8 : f32 to vector<4x16x4xf32>
    %38 = arith.addf %37, %36 : vector<4x16x4xf32>
    %39 = arith.divf %37, %38 : vector<4x16x4xf32>
    %40 = arith.mulf %34, %39 : vector<4x16x4xf32>
    %41 = vector.extract_strided_slice %32 {offsets = [0, 0, 4], sizes = [4, 16, 4], strides = [1, 1, 1]} : vector<4x16x16xf32> to vector<4x16x4xf32>
    %42 = vector.extract_strided_slice %32 {offsets = [0, 0, 8], sizes = [4, 16, 8], strides = [1, 1, 1]} : vector<4x16x16xf32> to vector<4x16x8xf32>
    %c0_9 = arith.constant 0 : index
    %c0_10 = arith.constant 0 : index
    %43 = vector.load %arg5[%c0_9, %c0_10] : memref<16x4xf32, #tpu.memory_space<vmem>>, vector<16x2xf32>
    %44 = vector.shape_cast %43 : vector<16x2xf32> to vector<1x16x2xf32>
    %c0_11 = arith.constant 0 : index
    %c2 = arith.constant 2 : index
    %45 = vector.load %arg5[%c0_11, %c2] : memref<16x4xf32, #tpu.memory_space<vmem>>, vector<16x2xf32>
    %46 = vector.shape_cast %45 : vector<16x2xf32> to vector<1x16x2xf32>
    %47 = vector.extract_strided_slice %40 {offsets = [0, 0, 0], sizes = [4, 16, 2], strides = [1, 1, 1]} : vector<4x16x4xf32> to vector<4x16x2xf32>
    %48 = vector.extract_strided_slice %40 {offsets = [0, 0, 2], sizes = [4, 16, 2], strides = [1, 1, 1]} : vector<4x16x4xf32> to vector<4x16x2xf32>
    %49 = vector.broadcast %44 : vector<1x16x2xf32> to vector<4x16x2xf32>
    %50 = arith.mulf %47, %49 : vector<4x16x2xf32>
    %51 = vector.broadcast %46 : vector<1x16x2xf32> to vector<4x16x2xf32>
    %52 = arith.mulf %48, %51 : vector<4x16x2xf32>
    %53 = arith.subf %50, %52 : vector<4x16x2xf32>
    %54 = vector.broadcast %44 : vector<1x16x2xf32> to vector<4x16x2xf32>
    %55 = arith.mulf %48, %54 : vector<4x16x2xf32>
    %56 = vector.broadcast %46 : vector<1x16x2xf32> to vector<4x16x2xf32>
    %57 = arith.mulf %47, %56 : vector<4x16x2xf32>
    %58 = arith.addf %55, %57 : vector<4x16x2xf32>
    %59 = tpu.concatenate %53, %58 in 2 : vector<4x16x2xf32>, vector<4x16x2xf32> -> vector<4x16x4xf32>
    %60 = vector.extract_strided_slice %41 {offsets = [0, 0, 0], sizes = [4, 16, 2], strides = [1, 1, 1]} : vector<4x16x4xf32> to vector<4x16x2xf32>
    %61 = vector.extract_strided_slice %41 {offsets = [0, 0, 2], sizes = [4, 16, 2], strides = [1, 1, 1]} : vector<4x16x4xf32> to vector<4x16x2xf32>
    %62 = vector.broadcast %44 : vector<1x16x2xf32> to vector<4x16x2xf32>
    %63 = arith.mulf %60, %62 : vector<4x16x2xf32>
    %64 = vector.broadcast %46 : vector<1x16x2xf32> to vector<4x16x2xf32>
    %65 = arith.mulf %61, %64 : vector<4x16x2xf32>
    %66 = arith.subf %63, %65 : vector<4x16x2xf32>
    %67 = vector.broadcast %44 : vector<1x16x2xf32> to vector<4x16x2xf32>
    %68 = arith.mulf %61, %67 : vector<4x16x2xf32>
    %69 = vector.broadcast %46 : vector<1x16x2xf32> to vector<4x16x2xf32>
    %70 = arith.mulf %60, %69 : vector<4x16x2xf32>
    %71 = arith.addf %68, %70 : vector<4x16x2xf32>
    %72 = tpu.concatenate %66, %71 in 2 : vector<4x16x2xf32>, vector<4x16x2xf32> -> vector<4x16x4xf32>
    %c0_12 = arith.constant 0 : index
    %c0_13 = arith.constant 0 : index
    %c0_14 = arith.constant 0 : index
    %73 = vector.load %arg4[%c0_12, %c0_13, %c0_14] : memref<4x8x2xf32, #tpu.memory_space<vmem>>, vector<4x8x2xf32>
    "tpu.trace_start"() <{level = 10 : i32, message = "hld,hdr->hlr"}> : () -> ()
    %cst_15 = arith.constant dense<0.000000e+00> : vector<4x16x2xf32>
    %74 = tpu.matmul %42, %73, %cst_15 {dimension_numbers = #tpu.dot_dimension_numbers<[2], [1], [1], [2], [0, 0, 0, 1, 1, 2], [0], [0]>} : vector<4x16x8xf32>, vector<4x8x2xf32>, vector<4x16x2xf32> -> vector<4x16x2xf32>
    "tpu.trace_stop"() : () -> ()
    %cst_16 = arith.constant dense<0xFF800000> : vector<4x16xf32>
    %75 = vector.multi_reduction <maximumf>, %74, %cst_16 [2] : vector<4x16x2xf32> to vector<4x16xf32>
    %cst_17 = arith.constant 0xFF800000 : f32
    %76 = vector.broadcast %cst_17 : f32 to vector<4x16xf32>
    %77 = arith.maximumf %76, %75 : vector<4x16xf32>
    %78 = vector.shape_cast %77 : vector<4x16xf32> to vector<4x16x1xf32>
    %79 = vector.broadcast %78 : vector<4x16x1xf32> to vector<4x16x2xf32>
    %80 = arith.subf %74, %79 : vector<4x16x2xf32>
    %81 = math.exp %80 : vector<4x16x2xf32>
    %cst_18 = arith.constant dense<0.000000e+00> : vector<4x16xf32>
    %82 = vector.multi_reduction <add>, %81, %cst_18 [2] : vector<4x16x2xf32> to vector<4x16xf32>
    %83 = vector.shape_cast %82 : vector<4x16xf32> to vector<4x16x1xf32>
    %84 = vector.broadcast %83 : vector<4x16x1xf32> to vector<4x16x2xf32>
    %85 = arith.divf %81, %84 : vector<4x16x2xf32>
    %cst_19 = arith.constant dense<0xFF800000> : vector<4x16xf32>
    %86 = vector.multi_reduction <maximumf>, %85, %cst_19 [2] : vector<4x16x2xf32> to vector<4x16xf32>
    %87 = vector.shape_cast %86 : vector<4x16xf32> to vector<4x16x1xf32>
    %88 = tpu.iota {dimensions = array<i32: 2>} : vector<4x16x2xi32>
    %89 = arith.sitofp %88 : vector<4x16x2xi32> to vector<4x16x2xf32>
    %90 = vector.broadcast %87 : vector<4x16x1xf32> to vector<4x16x2xf32>
    %91 = arith.cmpf oge, %85, %90 : vector<4x16x2xf32>
    %cst_20 = arith.constant 2.000000e+00 : f32
    %92 = vector.broadcast %cst_20 : f32 to vector<4x16x2xf32>
    %93 = arith.select %91, %89, %92 : vector<4x16x2xi1>, vector<4x16x2xf32>
    %cst_21 = arith.constant dense<0x7F800000> : vector<4x16xf32>
    %94 = vector.multi_reduction <minimumf>, %93, %cst_21 [2] : vector<4x16x2xf32> to vector<4x16xf32>
    %95 = vector.shape_cast %94 : vector<4x16xf32> to vector<4x16x1xf32>
    %96 = vector.broadcast %95 : vector<4x16x1xf32> to vector<4x16x2xf32>
    %97 = arith.cmpf oeq, %89, %96 : vector<4x16x2xf32>
    %98 = arith.extui %97 : vector<4x16x2xi1> to vector<4x16x2xi32>
    %99 = arith.sitofp %98 : vector<4x16x2xi32> to vector<4x16x2xf32>
    %c0_22 = arith.constant 0 : index
    %c0_23 = arith.constant 0 : index
    %100 = vector.load %arg6[%c0_22, %c0_23] : memref<16x16xf32, #tpu.memory_space<vmem>>, vector<16x16xf32>
    %101 = vector.shape_cast %100 : vector<16x16xf32> to vector<1x16x16xf32>
    %102 = vector.broadcast %101 : vector<1x16x16xf32> to vector<4x16x16xf32>
    "tpu.trace_start"() <{level = 10 : i32, message = "hlm,hmr->hlr"}> : () -> ()
    %cst_24 = arith.constant dense<0.000000e+00> : vector<4x16x2xf32>
    %103 = tpu.matmul %102, %99, %cst_24 {dimension_numbers = #tpu.dot_dimension_numbers<[2], [1], [1], [2], [0, 0, 0, 1, 1, 2], [0], [0]>} : vector<4x16x16xf32>, vector<4x16x2xf32>, vector<4x16x2xf32> -> vector<4x16x2xf32>
    %cst_25 = arith.constant 0.000000e+00 : f32
    "tpu.trace_stop"() : () -> ()
    %104 = vector.broadcast %cst_25 : f32 to vector<4x16x2xf32>
    %105 = arith.cmpf ogt, %103, %104 : vector<4x16x2xf32>
    %cst_26 = arith.constant 1.000000e+00 : f32
    %106 = vector.broadcast %cst_26 : f32 to vector<4x16x2xf32>
    %107 = arith.maximumf %103, %106 : vector<4x16x2xf32>
    %cst_27 = arith.constant 1.000000e+00 : f32
    %108 = vector.broadcast %cst_27 : f32 to vector<4x16x2xf32>
    %109 = arith.divf %108, %107 : vector<4x16x2xf32>
    %cst_28 = arith.constant 0.000000e+00 : f32
    %110 = vector.broadcast %cst_28 : f32 to vector<4x16x2xf32>
    %111 = arith.select %105, %109, %110 : vector<4x16x2xi1>, vector<4x16x2xf32>
    %112 = vector.broadcast %87 : vector<4x16x1xf32> to vector<4x16x2xf32>
    %113 = arith.mulf %99, %112 : vector<4x16x2xf32>
    %114 = arith.mulf %113, %111 : vector<4x16x2xf32>
    %115 = vector.extract_strided_slice %114 {offsets = [0, 0, 0], sizes = [4, 16, 1], strides = [1, 1, 1]} : vector<4x16x2xf32> to vector<4x16x1xf32>
    %116 = vector.broadcast %115 : vector<4x16x1xf32> to vector<4x16x4xf32>
    %117 = arith.mulf %59, %116 : vector<4x16x4xf32>
    %118 = vector.extract_strided_slice %114 {offsets = [0, 0, 1], sizes = [4, 16, 1], strides = [1, 1, 1]} : vector<4x16x2xf32> to vector<4x16x1xf32>
    %119 = vector.broadcast %118 : vector<4x16x1xf32> to vector<4x16x4xf32>
    %120 = arith.mulf %59, %119 : vector<4x16x4xf32>
    %121 = tpu.concatenate %117, %120 in 2 : vector<4x16x4xf32>, vector<4x16x4xf32> -> vector<4x16x8xf32>
    %122 = arith.truncf %121 : vector<4x16x8xf32> to vector<4x16x8xbf16>
    %123 = vector.extract_strided_slice %99 {offsets = [0, 0, 0], sizes = [4, 16, 1], strides = [1, 1, 1]} : vector<4x16x2xf32> to vector<4x16x1xf32>
    %124 = vector.broadcast %123 : vector<4x16x1xf32> to vector<4x16x4xf32>
    %125 = arith.mulf %72, %124 : vector<4x16x4xf32>
    %126 = vector.extract_strided_slice %99 {offsets = [0, 0, 1], sizes = [4, 16, 1], strides = [1, 1, 1]} : vector<4x16x2xf32> to vector<4x16x1xf32>
    %127 = vector.broadcast %126 : vector<4x16x1xf32> to vector<4x16x4xf32>
    %128 = arith.mulf %72, %127 : vector<4x16x4xf32>
    %129 = tpu.concatenate %125, %128 in 2 : vector<4x16x4xf32>, vector<4x16x4xf32> -> vector<4x16x8xf32>
    %130 = arith.truncf %129 : vector<4x16x8xf32> to vector<4x16x8xbf16>
    "tpu.trace_start"() <{level = 10 : i32, message = "hld,hmd->hlm"}> : () -> ()
    %cst_29 = arith.constant dense<0.000000e+00> : vector<4x16x16xf32>
    %131 = tpu.matmul %122, %130, %cst_29 {dimension_numbers = #tpu.dot_dimension_numbers<[2], [2], [1], [1], [0, 0, 0, 1, 1, 1], [0], [0]>} : vector<4x16x8xbf16>, vector<4x16x8xbf16>, vector<4x16x16xf32> -> vector<4x16x16xf32>
    "tpu.trace_stop"() : () -> ()
    %cst_30 = arith.constant 5.000000e-01 : f32
    %132 = vector.broadcast %cst_30 : f32 to vector<4x16x16xf32>
    %133 = arith.mulf %131, %132 : vector<4x16x16xf32>
    %134 = vector.shape_cast %100 : vector<16x16xf32> to vector<1x16x16xf32>
    %135 = vector.broadcast %134 : vector<1x16x16xf32> to vector<4x16x16xf32>
    %136 = arith.mulf %133, %135 : vector<4x16x16xf32>
    %137 = arith.truncf %136 : vector<4x16x16xf32> to vector<4x16x16xbf16>
    %138 = arith.truncf %42 : vector<4x16x8xf32> to vector<4x16x8xbf16>
    "tpu.trace_start"() <{level = 10 : i32, message = "hlm,hmd->hld"}> : () -> ()
    %cst_31 = arith.constant dense<0.000000e+00> : vector<4x16x8xf32>
    %139 = tpu.matmul %137, %138, %cst_31 {dimension_numbers = #tpu.dot_dimension_numbers<[2], [1], [1], [2], [0, 0, 0, 1, 1, 2], [0], [0]>} : vector<4x16x16xbf16>, vector<4x16x8xbf16>, vector<4x16x8xf32> -> vector<4x16x8xf32>
    "tpu.trace_stop"() : () -> ()
    %cst_32 = arith.constant dense<0.000000e+00> : vector<4x16xf32>
    %140 = vector.multi_reduction <add>, %139, %cst_32 [2] : vector<4x16x8xf32> to vector<4x16xf32>
    %141 = vector.shape_cast %140 : vector<4x16xf32> to vector<4x16x1xf32>
    %cst_33 = arith.constant 8.000000e+00 : f32
    %142 = vector.broadcast %cst_33 : f32 to vector<4x16x1xf32>
    %143 = arith.divf %141, %142 : vector<4x16x1xf32>
    %144 = vector.broadcast %143 : vector<4x16x1xf32> to vector<4x16x8xf32>
    %145 = arith.subf %139, %144 : vector<4x16x8xf32>
    %146 = arith.mulf %145, %145 : vector<4x16x8xf32>
    %cst_34 = arith.constant dense<0.000000e+00> : vector<4x16xf32>
    %147 = vector.multi_reduction <add>, %146, %cst_34 [2] : vector<4x16x8xf32> to vector<4x16xf32>
    %148 = vector.shape_cast %147 : vector<4x16xf32> to vector<4x16x1xf32>
    %cst_35 = arith.constant 8.000000e+00 : f32
    %149 = vector.broadcast %cst_35 : f32 to vector<4x16x1xf32>
    %150 = arith.divf %148, %149 : vector<4x16x1xf32>
    %151 = vector.broadcast %143 : vector<4x16x1xf32> to vector<4x16x8xf32>
    %152 = arith.subf %139, %151 : vector<4x16x8xf32>
    %cst_36 = arith.constant 9.99999974E-6 : f32
    %153 = vector.broadcast %cst_36 : f32 to vector<4x16x1xf32>
    %154 = arith.addf %150, %153 : vector<4x16x1xf32>
    %155 = math.rsqrt %154 : vector<4x16x1xf32>
    %156 = vector.broadcast %155 : vector<4x16x1xf32> to vector<4x16x8xf32>
    %157 = arith.mulf %152, %156 : vector<4x16x8xf32>
    %158 = vector.extract_strided_slice %157 {offsets = [0, 0, 0], sizes = [1, 16, 8], strides = [1, 1, 1]} : vector<4x16x8xf32> to vector<1x16x8xf32>
    %159 = vector.shape_cast %158 : vector<1x16x8xf32> to vector<16x8xf32>
    %160 = vector.extract_strided_slice %157 {offsets = [1, 0, 0], sizes = [1, 16, 8], strides = [1, 1, 1]} : vector<4x16x8xf32> to vector<1x16x8xf32>
    %161 = vector.shape_cast %160 : vector<1x16x8xf32> to vector<16x8xf32>
    %162 = vector.extract_strided_slice %157 {offsets = [2, 0, 0], sizes = [1, 16, 8], strides = [1, 1, 1]} : vector<4x16x8xf32> to vector<1x16x8xf32>
    %163 = vector.shape_cast %162 : vector<1x16x8xf32> to vector<16x8xf32>
    %164 = vector.extract_strided_slice %157 {offsets = [3, 0, 0], sizes = [1, 16, 8], strides = [1, 1, 1]} : vector<4x16x8xf32> to vector<1x16x8xf32>
    %165 = vector.shape_cast %164 : vector<1x16x8xf32> to vector<16x8xf32>
    %166 = tpu.concatenate %159, %161, %163, %165 in 1 : vector<16x8xf32>, vector<16x8xf32>, vector<16x8xf32>, vector<16x8xf32> -> vector<16x32xf32>
    %167 = arith.negf %33 : vector<16x32xf32>
    %168 = math.exp %167 : vector<16x32xf32>
    %cst_37 = arith.constant 1.000000e+00 : f32
    %169 = vector.broadcast %cst_37 : f32 to vector<16x32xf32>
    %170 = arith.addf %169, %168 : vector<16x32xf32>
    %171 = arith.divf %169, %170 : vector<16x32xf32>
    %172 = arith.mulf %33, %171 : vector<16x32xf32>
    %173 = arith.mulf %172, %166 : vector<16x32xf32>
    %174 = arith.truncf %173 : vector<16x32xf32> to vector<16x32xbf16>
    %c0_38 = arith.constant 0 : index
    %c0_39 = arith.constant 0 : index
    %175 = vector.load %arg3[%c0_38, %c0_39] : memref<32x32xbf16, #tpu.memory_space<vmem>>, vector<32x32xbf16>
    %cst_40 = arith.constant dense<0.000000e+00> : vector<16x32xf32>
    %176 = tpu.matmul %174, %175, %cst_40 {dimension_numbers = #tpu.dot_dimension_numbers<[1], [0], [0], [1], [0, 0, 1, 1], [], []>} : vector<16x32xbf16>, vector<32x32xbf16>, vector<16x32xf32> -> vector<16x32xf32>
    %c0_41 = arith.constant 0 : index
    %c0_42 = arith.constant 0 : index
    %177 = vector.load %arg7[%c0_41, %c0_42] : memref<16x32xf32, #tpu.memory_space<vmem>>, vector<16x32xf32>
    tpu.vector_store %arg7[%c0_41, %c0_42], %176 {strides = array<i32>} : memref<16x32xf32, #tpu.memory_space<vmem>>, vector<16x32xf32>,
    return
  }
}

</mosaic_0001>

<bundles_post_ra>
// kernel: tpu_custom_call.1
= control target key start
LH: loop header
LB: loop body
LE: loop exit
PB: predicated region body
PF: predicated region fallthrough
CT: control target
= control target key end

     0   :  { %12 = vsyncpa [#allocation3], 0  ;;  %s3772_s0 = inlined_call_operand.vmem [shape: f32[16,32], index: 0, kind: input, shape index: {}]   ;;  %s3773_s1 = inlined_call_operand.vmem [shape: f32[2,32], index: 1, kind: input, shape index: {}]   ;;  %s3774_s2 = inlined_call_operand.vmem [shape: bf16[32,96], index: 2, kind: input, shape index: {}]   ;;  %s3775_s3 = inlined_call_operand.vmem [shape: bf16[32,32], index: 3, kind: input, shape index: {}]   ;;  %s3776_s4 = inlined_call_operand.vmem [shape: f32[4,8,2], index: 4, kind: input, shape index: {}]   ;;  %s3777_s5 = inlined_call_operand.vmem [shape: f32[16,4], index: 5, kind: input, shape index: {}]   ;;  %s3778_s6 = inlined_call_operand.hbm [shape: f32[16,16], index: 6, kind: input, shape index: {}]   ;;  %s3779_s7 = inlined_call_operand.hbm [shape: f32[16,32], index: 7, kind: output, shape index: {}]  }
   0x1   :  { %13 = vsyncpa [#allocation4], 0  ;;  %s30_s26 = sshll.u32 %s3778_s6, 4  ;;  %s2486_s27 = smov [#allocation2]   ;;  %s31_s26 = int_to_ptr.hbm [resolvable:$true] %s30_s26 }
   0x2   :  { %s32_s28 = sshll.u32 %s2486_s27, 4  ;;  %s2487_s29 = smov 128   ;;  %s33_s28 = int_to_ptr.vmem [resolvable:$true] %s32_s28 }
   0x3   :  { %s2488_s30 = smov 8  }
   0x4   :  { %38 = dma.hbm_to_vmem [thread:$0]  %s31_s26, 256, %s33_s28, [#allocation3], %s2487_s29, %s2487_s29, %s2488_s30  }
   0x5   :  { %2482 = dma.done.wait [#allocation3], 256  }
   0x6   :  { %2483 = vsyncadd [#allocation3], 4294967040  ;;  %v46_v0 = vlaneseq  ;;  %v2207_v2 = vld [vmem:[%s3774_s2 + $0x8] sm:$0xff]  ;;  %v44_v3 = vld [vmem:[%s3772_s0] sm:$0xff]  ;;  %vm123_vm9 = vcmask 261120   ;;  %s2492_s17 = smov 120  }
   0x7   :  { %v45_v4 = vld [vmem:[%s3772_s0 + $0x8] sm:$0xff]  ;;  %v51_v5 = vrot.slane %v44_v3, 6  ;;  %v57_v6 = vld [vmem:[%s3773_s1] sm:$0x3]  ;;  %133 = vmatpush.bf16.msra.mxu0 %v2207_v2  ;;  %s2489_s0 = smov 96   ;;  %s2490_s1 = smov 80  }
   0x8   :  { %v47_v1 = vshrl.u32 %v46_v0, 7  ;;  %v2206_v7 = vld [vmem:[%s3774_s2] sm:$0xff]  ;;  %v52_v8 = vrot.slane %v45_v4, 6  ;;  %v58_v9 = vperm.slane %v57_v6, 0  ;;  %v61_v10 = vperm.slane %v57_v6, 1  ;;  %s2491_s2 = smov 112  }
   0x9   :  { %v638_v51 = vld [vmem:[%s3776_s4] sm:$0xff]  ;;  %v639_v53 = vld [vmem:[%s3776_s4 + $0x8] sm:$0xff]  ;;  %vm646_vm10 = vcmask 64512   ;;  %v640_v60 = vld [vmem:[%s3776_s4 + $0x10] sm:$0xff]  ;;  %vm441_vm11 = vcmask 15360   ;;  %s2493_s27 = smov 2  }
   0xa   :  { %vm49_vm0 = vcmp.lt.s32.totalorder %v47_v1, 2  ;;  %v62_v13 = vmul.f32 %v61_v10, %v44_v3  ;;  %v63_v14 = vmul.f32 %v61_v10, %v45_v4  ;;  %2210 = vmatpush.msra.mxu3 %v638_v51  ;;  %666 = vmatpush.msra.mxu1 %v638_v51  ;;  %v641_v61 = vld [vmem:[%s3776_s4 + $0x18] sm:$0xff]  ;;  %s2494_s9 = smov 4   ;;  %s2495_s6 = smov 6  }
   0xb   :  { %v53_v11 = vsel %vm49_vm0, %v51_v5, %v52_v8  ;;  %v54_v12 = vsel %vm49_vm0, %v52_v8, %v51_v5  ;;  %134 = vmatpush.bf16.msra.mxu0 %v2206_v7  ;;  %2211 = vmatpush.msra.mxu2 %v639_v53  ;;  %s2498_s10 = smov 126   ;;  %s2499_s11 = smov 124  }
   0xc   :  { %v55_v15 = vsel %vm49_vm0, 0.0, %v54_v12  ;;  %v60_v16 = vmul.f32 %v58_v9, %v53_v11  ;;  %728 = vmatpush.msrb.mxu3 %v640_v60  ;;  %759 = vmatpush.msrb.mxu1 %v641_v61  ;;  %s2504_s16 = smov 24   ;;  %s2506_s19 = smov [#allocation5]  }
   0xd   :  { %v59_v17 = vmul.f32 %v58_v9, %v55_v15  ;;  %s2123_s20 = sshll.u32 %s2506_s19, 4  ;;  %s2124_s20 = int_to_ptr.vmem [resolvable:$true] %s2123_s20 }
   0xe   :  { %v65_v18 = vadd.f32 %v63_v14, %v60_v16 }
   0xf   :  { %v64_v19 = vadd.f32 %v62_v13, %v59_v17  ;;  %697 = vmatpush.msrb.mxu0 %v639_v53 }
  0x10   :  { %v2139_v20 = vmul.f32 -1.442695, %v65_v18 }
  0x11   :  { %v2138_v21 = vmul.f32 -1.442695, %v64_v19 }
  0x12   :  { %2324 = vpow2.f32 %v2139_v20 }
  0x13   :  { %2326 = vpow2.f32 %v2138_v21 }
  0x18   :  { %v2325_v22 = vpop.eup %2324 }
  0x19   :  { %v2327_v23 = vpop.eup %2326  ;;  %v73_v24 = vadd.f32 1.0, %v2325_v22 }
  0x1a   :  { %v72_v25 = vadd.f32 1.0, %v2327_v23 }
  0x1b   :  { %2328 = vrcp.f32 %v73_v24  ;;  %vm94_vm1 = vweird.f32 %v73_v24  ;;  %v100_v30 = vand.u32 2147483648, %v73_v24  ;;  %v98_v33 = vand.u32 2147483647, %v73_v24 }
  0x1c   :  { %2330 = vrcp.f32 %v72_v25  ;;  %v85_v31 = vand.u32 2147483648, %v72_v25  ;;  %vm79_vm3 = vweird.f32 %v72_v25  ;;  %v83_v35 = vand.u32 2147483647, %v72_v25 }
  0x1d   :  { %v101_v38 = vor.u32 1.1754944e-38, %v100_v30  ;;  %vm99_vm7 = vcmp.eq.f32.partialorder %v98_v33, 8.507059e+37 }
  0x1e   :  { %v86_v39 = vor.u32 1.1754944e-38, %v85_v31  ;;  %vm84_vm8 = vcmp.eq.f32.partialorder %v83_v35, 8.507059e+37 }
  0x21   :  { %v2329_v26 = vpop.eup %2328 }
  0x22   :  { %v2331_v27 = vpop.eup %2330  ;;  %v90_v28 = vmul.f32 %v2329_v26, %v73_v24  ;;  %vm95_vm2 = vweird.f32 %v2329_v26 }
  0x23   :  { %v75_v29 = vmul.f32 %v2331_v27, %v72_v25  ;;  %vm80_vm4 = vweird.f32 %v2331_v27  ;;  %vm96_vm5 = vmor %vm94_vm1, %vm95_vm2 }
  0x24   :  { %v91_v32 = vsub.f32 1.0, %v90_v28  ;;  %vm81_vm6 = vmor %vm79_vm3, %vm80_vm4 }
  0x25   :  { %v76_v34 = vsub.f32 1.0, %v75_v29 }
  0x26   :  { %v92_v36 = vmul.f32 %v2329_v26, %v91_v32 }
  0x27   :  { %v77_v37 = vmul.f32 %v2331_v27, %v76_v34 }
  0x28   :  { %v93_v40 = vadd.f32 %v2329_v26, %v92_v36 }
  0x29   :  { %v78_v41 = vadd.f32 %v2331_v27, %v77_v37 }
  0x2a   :  { %v97_v42 = vsel %vm96_vm5, %v2329_v26, %v93_v40 }
  0x2b   :  { %v82_v43 = vsel %vm81_vm6, %v2331_v27, %v78_v41  ;;  %v102_v44 = vsel %vm99_vm7, %v101_v38, %v97_v42 }
  0x2c   :  { %v87_v45 = vsel %vm84_vm8, %v86_v39, %v82_v43  ;;  %v105_v46 = vmul.f32 %v102_v44, %v65_v18 }
  0x2d   :  { %v104_v47 = vmul.f32 %v87_v45, %v64_v19 }
  0x2f   :  { %v106_v48 = vpack.c.bf16 %v105_v46, %v104_v47 }
  0x31   :  { %2148 = vmatmul.msk.bf16.vlgmr.msra.gmra.mxu0 %vm123_vm9, %v106_v48 }
  0xae   :  { %v2570_v49 = vpop.f32.mrf.mxu0 }
  0xaf   :  { %3808 = vst [vmem:[#allocation8_spill] sm:$0xff] %v2570_v49  ;;  %149 = vrot.lane.b32.xlu1 %v2570_v49, %s2489_s0 }
  0xb6   :  { %v2573_v50 = vpop.f32.mrf.mxu0 }
  0xb7   :  { %155 = vrot.lane.b32.xlu1 %v2570_v49, %s2490_s1  ;;  %151 = vrot.lane.b32.xlu2 %v2573_v50, %s2489_s0  ;;  %s2505_s0 = smov 64  }
  0xb8   :  { %145 = vrot.lane.b32.xlu0 %v2573_v50, %s2491_s2 }
  0xbf   :  { %644 = vrot.lane.b32.xlu1 %v2573_v50, %s2492_s17  ;;  %157 = vrot.lane.b32.xlu2 %v2573_v50, %s2490_s1 }
  0xc0   :  { %143 = vrot.lane.b32.xlu0 %v2570_v49, %s2491_s2 }
 0x111   :  { %v2585_v52 = vpop.permute.xlu2 %151 }
 0x112   :  { %3809 = vst [vmem:[#allocation9_spill] sm:$0xff] %v2585_v52 }
 0x119   :  { %v2594_v55 = vpop.permute.xlu2 %157 }
 0x11a   :  { %3811 = vst [vmem:[#allocation11_spill] sm:$0xff] %v2594_v55 }
 0x121   :  { %v2590_v54 = vpop.permute.xlu1 %149 }
 0x122   :  { %3810 = vst [vmem:[#allocation10_spill] sm:$0xff] %v2590_v54  ;;  %705 = vrot.lane.b32.xlu1 %v2590_v54, %s2492_s17 }
 0x129   :  { %v2596_v56 = vpop.permute.xlu1 %155 }
 0x12a   :  { %3812 = vst [vmem:[#allocation12_spill] sm:$0xff] %v2596_v56  ;;  %v2598_v57 = vpop.permute.xlu0 %145  ;;  %738 = vrot.lane.b32.xlu1 %v2594_v55, %s2492_s17 }
 0x12b   :  { %3813 = vst [vmem:[#allocation13_spill] sm:$0xff] %v2598_v57  ;;  %676 = vrot.lane.b32.xlu0 %v2598_v57, %s2492_s17 }
 0x131   :  { %v645_v58 = vpop.permute.xlu1 %644 }
 0x132   :  { %v2604_v59 = vpop.permute.xlu0 %143  ;;  %2158 = vmatmul.msk.f32.vlgmr.msra.gmra.mxu3 %vm646_vm10, %v645_v58 }
 0x133   :  { %3814 = vst [vmem:[#allocation14_spill] sm:$0xff] %v2604_v59  ;;  %642 = vrot.lane.b32.xlu0 %v2570_v49, %s2492_s17  ;;  %674 = vrot.lane.b32.xlu2 %v2604_v59, %s2492_s17 }
 0x13b   :  { %707 = vrot.lane.b32.xlu0 %v2585_v52, %s2492_s17  ;;  %736 = vrot.lane.b32.xlu2 %v2596_v56, %s2492_s17 }
 0x18d   :  { %v675_v62 = vpop.permute.xlu2 %674 }
 0x18e   :  { %2159 = vmatmul.msk.f32.vlgmr.msrb.gmra.mxu0 %vm646_vm10, %v675_v62 }
 0x194   :  { %v706_v63 = vpop.permute.xlu1 %705 }
 0x195   :  { %2161 = vmatmul.msk.f32.vlgmr.msrb.gmra.mxu3 %vm646_vm10, %v706_v63  ;;  %v737_v3 = vpop.permute.xlu2 %736 }
 0x19c   :  { %v739_v5 = vpop.permute.xlu1 %738 }
 0x19d   :  { %v677_v1 = vpop.permute.xlu0 %676 }
 0x19e   :  { %2160 = vmatmul.msk.f32.vlgmr.msra.gmra.mxu2 %vm646_vm10, %v677_v1 }
 0x1a5   :  { %v643_v2 = vpop.permute.xlu0 %642 }
 0x1a6   :  { %2157 = vmatmul.msk.f32.vlgmr.msra.gmra.mxu1 %vm646_vm10, %v643_v2 }
 0x1ad   :  { %v708_v4 = vpop.permute.xlu0 %707 }
 0x1ae   :  { %2162 = vmatmul.msk.f32.gmra.mxu3 %vm646_vm10, %v708_v4  ;;  %2163 = vmatmul.msk.f32.vlgmr.msrb.gmra.mxu1 %vm646_vm10, %v737_v3 }
 0x1b5   :  { %v671_v8 = vpop.f32.mrf.mxu3 }
 0x1b6   :  { %2164 = vmatmul.msk.f32.gmra.mxu1 %vm646_vm10, %v739_v5  ;;  %v770_v19 = vsel %vm441_vm11, %v671_v8, -inf }
 0x20b   :  { %v699_v6 = vpop.f32.mrf.mxu0 }
 0x20c   :  { %v773_v7 = vsel %vm441_vm11, %v699_v6, -inf }
 0x20d   :  { %774 = vmax.xlane.f32.xlu0 %v773_v7 }
 0x218   :  { %v730_v12 = vpop.f32.mrf.mxu3 }
 0x219   :  { %v779_v20 = vsel %vm441_vm11, %v730_v12, -inf }
 0x221   :  { %v702_v9 = vpop.f32.mrf.mxu2 }
 0x222   :  { %v776_v10 = vsel %vm441_vm11, %v702_v9, -inf }
 0x223   :  { %777 = vmax.xlane.f32.xlu2 %v776_v10  ;;  %v668_v11 = vpop.f32.mrf.mxu1 }
 0x224   :  { %v767_v21 = vsel %vm441_vm11, %v668_v11, -inf }
 0x22b   :  { %v761_v13 = vpop.f32.mrf.mxu1 }
 0x22c   :  { %v785_v14 = vsel %vm441_vm11, %v761_v13, -inf }
 0x22d   :  { %786 = vmax.xlane.f32.xlu0 %v785_v14 }
 0x231   :  { %v733_v15 = vpop.f32.mrf.mxu3 }
 0x232   :  { %v782_v16 = vsel %vm441_vm11, %v733_v15, -inf }
 0x233   :  { %v764_v17 = vpop.f32.mrf.mxu1  ;;  %783 = vmax.xlane.f32.xlu1 %v782_v16 }
 0x234   :  { %v788_v18 = vsel %vm441_vm11, %v764_v17, -inf }
 0x235   :  { %789 = vmax.xlane.f32.xlu2 %v788_v18 }
 0x23b   :  { %771 = vmax.xlane.f32.xlu1 %v770_v19 }
 0x23d   :  { %780 = vmax.xlane.f32.xlu2 %v779_v20 }
 0x245   :  { %768 = vmax.xlane.f32.xlu2 %v767_v21 }
 0x280   :  { %v775_v22 = vpop.xlane.xlu0 %774 }
 0x281   :  { %v793_v23 = vsub.f32 %v699_v6, %v775_v22 }
 0x283   :  { %v803_v24 = vmul.f32 1.442695, %v793_v23 }
 0x285   :  { %2332 = vpow2.f32 %v803_v24 }
 0x28b   :  { %v2636_v25 = vpop.eup %2332 }
 0x28c   :  { %v821_v26 = vsel %vm441_vm11, %v2636_v25, 0.0 }
 0x28d   :  { %822 = vadd.xlane.f32.xlu1 %v821_v26 }
 0x296   :  { %v778_v27 = vpop.xlane.xlu2 %777 }
 0x297   :  { %v794_v35 = vsub.f32 %v702_v9, %v778_v27 }
 0x299   :  { %v805_v38 = vmul.f32 1.442695, %v794_v35 }
 0x2a0   :  { %v787_v28 = vpop.xlane.xlu0 %786 }
 0x2a1   :  { %v797_v32 = vsub.f32 %v761_v13, %v787_v28 }
 0x2a3   :  { %v811_v37 = vmul.f32 1.442695, %v797_v32 }
 0x2a6   :  { %v784_v29 = vpop.xlane.xlu1 %783 }
 0x2a7   :  { %v796_v30 = vsub.f32 %v733_v15, %v784_v29 }
 0x2a8   :  { %v790_v31 = vpop.xlane.xlu2 %789 }
 0x2a9   :  { %v809_v33 = vmul.f32 1.442695, %v796_v30  ;;  %v798_v34 = vsub.f32 %v764_v17, %v790_v31 }
 0x2ab   :  { %2334 = vpow2.f32 %v809_v33  ;;  %v813_v36 = vmul.f32 1.442695, %v798_v34 }
 0x2ad   :  { %2336 = vpow2.f32 %v813_v36 }
 0x2ae   :  { %v772_v39 = vpop.xlane.xlu1 %771  ;;  %2338 = vpow2.f32 %v811_v37 }
 0x2af   :  { %2340 = vpow2.f32 %v805_v38  ;;  %v792_v45 = vsub.f32 %v671_v8, %v772_v39 }
 0x2b0   :  { %v781_v40 = vpop.xlane.xlu2 %780 }
 0x2b1   :  { %v2640_v41 = vpop.eup %2334  ;;  %v795_v42 = vsub.f32 %v730_v12, %v781_v40  ;;  %v801_v51 = vmul.f32 1.442695, %v792_v45 }
 0x2b2   :  { %v830_v43 = vsel %vm441_vm11, %v2640_v41, 0.0 }
 0x2b3   :  { %v2644_v44 = vpop.eup %2336  ;;  %v807_v46 = vmul.f32 1.442695, %v795_v42  ;;  %831 = vadd.xlane.f32.xlu2 %v830_v43 }
 0x2b4   :  { %v836_v47 = vsel %vm441_vm11, %v2644_v44, 0.0  ;;  %v2648_v48 = vpop.eup %2338 }
 0x2b5   :  { %2342 = vpow2.f32 %v807_v46  ;;  %837 = vadd.xlane.f32.xlu0 %v836_v47  ;;  %v2650_v58 = vpop.eup %2340  ;;  %v833_v61 = vsel %vm441_vm11, %v2648_v48, 0.0 }
 0x2b6   :  { %2344 = vpow2.f32 %v801_v51  ;;  %v824_v1 = vsel %vm441_vm11, %v2650_v58, 0.0 }
 0x2b8   :  { %v769_v53 = vpop.xlane.xlu2 %768 }
 0x2b9   :  { %v791_v60 = vsub.f32 %v668_v11, %v769_v53 }
 0x2bb   :  { %v2654_v62 = vpop.eup %2342  ;;  %v799_v63 = vmul.f32 1.442695, %v791_v60  ;;  %834 = vadd.xlane.f32.xlu2 %v833_v61 }
 0x2bc   :  { %v827_v2 = vsel %vm441_vm11, %v2654_v62, 0.0  ;;  %v2660_v3 = vpop.eup %2344 }
 0x2bd   :  { %2346 = vpow2.f32 %v799_v63  ;;  %825 = vadd.xlane.f32.xlu0 %v824_v1  ;;  %828 = vadd.xlane.f32.xlu1 %v827_v2  ;;  %v818_v5 = vsel %vm441_vm11, %v2660_v3, 0.0 }
 0x2c3   :  { %v2662_v4 = vpop.eup %2346 }
 0x2c4   :  { %v815_v6 = vsel %vm441_vm11, %v2662_v4, 0.0 }
 0x2c5   :  { %819 = vadd.xlane.f32.xlu0 %v818_v5  ;;  %816 = vadd.xlane.f32.xlu1 %v815_v6 }
 0x300   :  { %v823_v7 = vpop.xlane.xlu1 %822 }
 0x301   :  { %2348 = vrcp.f32 %v823_v7  ;;  %v880_v11 = vand.u32 2147483648, %v823_v7  ;;  %v878_v13 = vand.u32 2147483647, %v823_v7  ;;  %vm874_vm13 = vweird.f32 %v823_v7 }
 0x303   :  { %v881_v15 = vor.u32 1.1754944e-38, %v880_v11  ;;  %vm879_vm15 = vcmp.eq.f32.partialorder %v878_v13, 8.507059e+37 }
 0x307   :  { %v2349_v8 = vpop.eup %2348 }
 0x308   :  { %v870_v9 = vmul.f32 %v2349_v8, %v823_v7  ;;  %vm875_vm12 = vweird.f32 %v2349_v8 }
 0x309   :  { %vm876_vm14 = vmor %vm874_vm13, %vm875_vm12 }
 0x30a   :  { %v871_v10 = vsub.f32 1.0, %v870_v9 }
 0x30c   :  { %v872_v12 = vmul.f32 %v2349_v8, %v871_v10 }
 0x30e   :  { %v873_v14 = vadd.f32 %v2349_v8, %v872_v12 }
 0x310   :  { %v877_v16 = vsel %vm876_vm14, %v2349_v8, %v873_v14 }
 0x311   :  { %v882_v17 = vsel %vm879_vm15, %v881_v15, %v877_v16 }
 0x312   :  { %v2669_v18 = vmul.f32 %v2636_v25, %v882_v17 }
 0x314   :  { %v965_v19 = vsel %vm441_vm11, %v2669_v18, -inf }
 0x315   :  { %966 = vmax.xlane.f32.xlu0 %v965_v19 }
 0x326   :  { %v832_v20 = vpop.xlane.xlu2 %831 }
 0x327   :  { %2350 = vrcp.f32 %v832_v20  ;;  %v923_v29 = vand.u32 2147483647, %v832_v20  ;;  %v925_v30 = vand.u32 2147483648, %v832_v20  ;;  %vm919_vm1 = vweird.f32 %v832_v20 }
 0x328   :  { %v2673_v21 = vpop.xlane.xlu0 %837 }
 0x329   :  { %2352 = vrcp.f32 %v2673_v21  ;;  %v955_v31 = vand.u32 2147483648, %v2673_v21  ;;  %vm924_vm3 = vcmp.eq.f32.partialorder %v923_v29, 8.507059e+37  ;;  %v926_v36 = vor.u32 1.1754944e-38, %v925_v30 }
 0x32a   :  { %v953_v37 = vand.u32 2147483647, %v2673_v21  ;;  %vm949_vm7 = vweird.f32 %v2673_v21 }
 0x32b   :  { %v2691_v38 = vor.u32 1.1754944e-38, %v955_v31 }
 0x32d   :  { %v2351_v22 = vpop.eup %2350 }
 0x32e   :  { %v915_v23 = vmul.f32 %v2351_v22, %v832_v20  ;;  %v2676_v24 = vpop.xlane.xlu2 %834  ;;  %vm920_vm0 = vweird.f32 %v2351_v22 }
 0x32f   :  { %2354 = vrcp.f32 %v2676_v24  ;;  %v2679_v26 = vpop.eup %2352  ;;  %vm921_vm2 = vmor %vm919_vm1, %vm920_vm0  ;;  %vm934_vm4 = vweird.f32 %v2676_v24  ;;  %v938_v42 = vand.u32 2147483647, %v2676_v24  ;;  %v940_v47 = vand.u32 2147483648, %v2676_v24 }
 0x330   :  { %v916_v25 = vsub.f32 1.0, %v915_v23  ;;  %v2681_v27 = vpop.xlane.xlu1 %828  ;;  %v2683_v28 = vpop.xlane.xlu0 %825  ;;  %v945_v33 = vmul.f32 %v2679_v26, %v2673_v21  ;;  %vm950_vm5 = vweird.f32 %v2679_v26 }
 0x331   :  { %2356 = vrcp.f32 %v2681_v27  ;;  %vm904_vm6 = vweird.f32 %v2681_v27  ;;  %v908_v5 = vand.u32 2147483647, %v2681_v27  ;;  %vm889_vm12 = vweird.f32 %v2683_v28 }
 0x332   :  { %v917_v32 = vmul.f32 %v2351_v22, %v916_v25  ;;  %2358 = vrcp.f32 %v2683_v28  ;;  %v946_v45 = vsub.f32 1.0, %v945_v33  ;;  %v910_v10 = vand.u32 2147483648, %v2681_v27 }
 0x333   :  { %v895_v13 = vand.u32 2147483648, %v2683_v28  ;;  %v941_v15 = vor.u32 1.1754944e-38, %v940_v47  ;;  %v893_v16 = vand.u32 2147483647, %v2683_v28  ;;  %vm939_vm0 = vcmp.eq.f32.partialorder %v938_v42, 8.507059e+37 }
 0x334   :  { %v918_v34 = vadd.f32 %v2351_v22, %v917_v32  ;;  %v947_v9 = vmul.f32 %v2679_v26, %v946_v45  ;;  %vm909_vm1 = vcmp.eq.f32.partialorder %v908_v5, 8.507059e+37  ;;  %v911_v23 = vor.u32 1.1754944e-38, %v910_v10 }
 0x335   :  { %v2355_v35 = vpop.eup %2354  ;;  %v896_v33 = vor.u32 1.1754944e-38, %v895_v13 }
 0x336   :  { %v930_v39 = vmul.f32 %v2355_v35, %v2676_v24  ;;  %v922_v40 = vsel %vm921_vm2, %v2351_v22, %v918_v34  ;;  %vm935_vm8 = vweird.f32 %v2355_v35  ;;  %v948_v29 = vadd.f32 %v2679_v26, %v947_v9 }
 0x337   :  { %v2357_v43 = vpop.eup %2356  ;;  %v927_v46 = vsel %vm924_vm3, %v926_v36, %v922_v40  ;;  %vm936_vm14 = vmor %vm934_vm4, %vm935_vm8  ;;  %vm894_vm4 = vcmp.eq.f32.partialorder %v893_v16, 8.507059e+37 }
 0x338   :  { %v2359_v51 = vpop.eup %2358  ;;  %v931_v53 = vsub.f32 1.0, %v930_v39  ;;  %v900_v60 = vmul.f32 %v2357_v43, %v2681_v27  ;;  %v2700_v61 = vpop.xlane.xlu1 %816  ;;  %v2705_v1 = vmul.f32 %v2640_v41, %v927_v46  ;;  %vm905_vm13 = vweird.f32 %v2357_v43 }
 0x339   :  { %v2702_v63 = vpop.xlane.xlu0 %819  ;;  %v885_v2 = vmul.f32 %v2359_v51, %v2683_v28  ;;  %2360 = vrcp.f32 %v2700_v61  ;;  %vm890_vm15 = vweird.f32 %v2359_v51  ;;  %vm906_vm2 = vmor %vm904_vm6, %vm905_vm13  ;;  %v850_v45 = vand.u32 2147483648, %v2700_v61 }
 0x33a   :  { %v932_v6 = vmul.f32 %v2355_v35, %v931_v53  ;;  %v901_v7 = vsub.f32 1.0, %v900_v60  ;;  %2362 = vrcp.f32 %v2702_v63  ;;  %v974_v8 = vsel %vm441_vm11, %v2705_v1, -inf  ;;  %vm891_vm3 = vmor %vm889_vm12, %vm890_vm15 }
 0x33b   :  { %v886_v41 = vsub.f32 1.0, %v885_v2  ;;  %975 = vmax.xlane.f32.xlu1 %v974_v8  ;;  %vm2740_vm6 = vmor %vm949_vm7, %vm950_vm5  ;;  %vm954_vm5 = vcmp.eq.f32.partialorder %v953_v37, 8.507059e+37  ;;  %vm844_vm7 = vweird.f32 %v2700_v61  ;;  %v851_v2 = vor.u32 1.1754944e-38, %v850_v45 }
 0x33c   :  { %v902_v11 = vmul.f32 %v2357_v43, %v901_v7  ;;  %v933_v12 = vadd.f32 %v2355_v35, %v932_v6  ;;  %v865_v7 = vand.u32 2147483648, %v2702_v63  ;;  %vm859_vm15 = vweird.f32 %v2702_v63 }
 0x33d   :  { %v887_v14 = vmul.f32 %v2359_v51, %v886_v41  ;;  %v863_v37 = vand.u32 2147483647, %v2702_v63  ;;  %v3780_v45 = vmov 0.0  }
 0x33e   :  { %v937_v17 = vsel %vm936_vm14, %v2355_v35, %v933_v12  ;;  %v903_v19 = vadd.f32 %v2357_v43, %v902_v11  ;;  %v866_v41 = vor.u32 1.1754944e-38, %v865_v7 }
 0x33f   :  { %v2361_v20 = vpop.eup %2360  ;;  %v942_v22 = vsel %vm939_vm0, %v941_v15, %v937_v17  ;;  %v888_v25 = vadd.f32 %v2359_v51, %v887_v14 }
 0x340   :  { %v2363_v30 = vpop.eup %2362  ;;  %v840_v24 = vmul.f32 %v2361_v20, %v2700_v61  ;;  %v2727_v31 = vmul.f32 %v2648_v48, %v942_v22  ;;  %v907_v32 = vsel %vm906_vm2, %v2357_v43, %v903_v19  ;;  %vm845_vm8 = vweird.f32 %v2361_v20 }
 0x341   :  { %v855_v34 = vmul.f32 %v2363_v30, %v2702_v63  ;;  %v912_v27 = vsel %vm909_vm1, %v911_v23, %v907_v32  ;;  %v892_v35 = vsel %vm891_vm3, %v2359_v51, %v888_v25  ;;  %v848_v51 = vand.u32 2147483647, %v2700_v61  ;;  %vm846_vm12 = vmor %vm844_vm7, %vm845_vm8 }
 0x342   :  { %v841_v36 = vsub.f32 1.0, %v840_v24  ;;  %v977_v39 = vsel %vm441_vm11, %v2727_v31, -inf  ;;  %v913_v40 = vmul.f32 %v2654_v62, %v912_v27  ;;  %v897_v42 = vsel %vm894_vm4, %v896_v33, %v892_v35  ;;  %v2811_v27 = vld [vmem:[%s3777_s5] sm:$0xff] }
 0x343   :  { %v856_v28 = vsub.f32 1.0, %v855_v34  ;;  %978 = vmax.xlane.f32.xlu1 %v977_v39  ;;  %v2745_v43 = vmul.f32 %v2650_v58, %v897_v42  ;;  %v952_v62 = vsel %vm2740_vm6, %v2679_v26, %v948_v29  ;;  %vm860_vm13 = vweird.f32 %v2363_v30  ;;  %v2821_v39 = vld [vmem:[%s3777_s5 + $0x8] sm:$0xff] }
 0x344   :  { %v842_v46 = vmul.f32 %v2361_v20, %v841_v36  ;;  %v971_v47 = vsel %vm441_vm11, %v913_v40, -inf  ;;  %v957_v26 = vsel %vm954_vm5, %v2691_v38, %v952_v62  ;;  %vm849_vm14 = vcmp.eq.f32.partialorder %v848_v51, 8.507059e+37  ;;  %vm861_vm0 = vmor %vm859_vm15, %vm860_vm13  ;;  %v2844_v51 = vld [vmem:[#allocation2] sm:$0xff] }
 0x345   :  { %v857_v53 = vmul.f32 %v2363_v30, %v856_v28  ;;  %972 = vmax.xlane.f32.xlu0 %v971_v47  ;;  %v968_v60 = vsel %vm441_vm11, %v2745_v43, -inf  ;;  %v958_v21 = vmul.f32 %v2644_v44, %v957_v26  ;;  %vm864_vm1 = vcmp.eq.f32.partialorder %v863_v37, 8.507059e+37 }
 0x346   :  { %969 = vmax.xlane.f32.xlu2 %v968_v60  ;;  %v843_v58 = vadd.f32 %v2361_v20, %v842_v46  ;;  %v984_v44 = vand.u32 127, %v46_v0  ;;  %v3782_v47 = vmov 1.0  }
 0x347   :  { %v858_v5 = vadd.f32 %v2363_v30, %v857_v53  ;;  %v980_v10 = vsel %vm441_vm11, %v958_v21, -inf }
 0x348   :  { %v847_v6 = vsel %vm846_vm12, %v2361_v20, %v843_v58  ;;  %v2769_v63 = vcvt.s32.f32 %v984_v44 }
 0x349   :  { %v852_v8 = vsel %vm849_vm14, %v851_v2, %v847_v6  ;;  %v862_v9 = vsel %vm861_vm0, %v2363_v30, %v858_v5  ;;  %vm1052_vm14 = vcmask 130048   ;;  %v2873_v6 = vld [vmem:[#allocation2 + $0x8] sm:$0xff] }
 0x34a   :  { %v853_v61 = vmul.f32 %v2662_v4, %v852_v8  ;;  %v867_v11 = vsel %vm864_vm1, %v866_v41, %v862_v9 }
 0x34b   :  { %v868_v12 = vmul.f32 %v2660_v3, %v867_v11 }
 0x34c   :  { %v959_v38 = vsel %vm441_vm11, %v853_v61, -inf }
 0x34d   :  { %960 = vmax.xlane.f32.xlu0 %v959_v38  ;;  %v962_v13 = vsel %vm441_vm11, %v868_v12, -inf }
 0x34e   :  { %981 = vmax.xlane.f32.xlu2 %v980_v10 }
 0x356   :  { %963 = vmax.xlane.f32.xlu2 %v962_v13 }
 0x388   :  { %v2771_v4 = vpop.xlane.xlu0 %966 }
 0x389   :  { %vm988_vm2 = vcmp.ge.f32.partialorder %v2669_v18, %v2771_v4 }
 0x38a   :  { %v996_v14 = vsel %vm988_vm2, %v2769_v63, 2.0 }
 0x38b   :  { %v1008_v15 = vsel %vm441_vm11, %v996_v14, inf }
 0x38c   :  { %1009 = vmin.xlane.f32.xlu2 %v1008_v15 }
 0x3ae   :  { %v2777_v16 = vpop.xlane.xlu1 %975 }
 0x3b6   :  { %v2779_v3 = vpop.xlane.xlu1 %978 }
 0x3b7   :  { %vm992_vm3 = vcmp.ge.f32.partialorder %v2727_v31, %v2779_v3 }
 0x3b8   :  { %v2783_v0 = vpop.xlane.xlu0 %972  ;;  %v1000_v17 = vsel %vm992_vm3, %v2769_v63, 2.0  ;;  %vm991_vm3 = vcmp.ge.f32.partialorder %v2705_v1, %v2777_v16 }
 0x3b9   :  { %v2786_v19 = vpop.xlane.xlu2 %969  ;;  %vm990_vm4 = vcmp.ge.f32.partialorder %v913_v40, %v2783_v0  ;;  %v1020_v18 = vsel %vm441_vm11, %v1000_v17, inf  ;;  %v999_v15 = vsel %vm991_vm3, %v2769_v63, 2.0 }
 0x3ba   :  { %1021 = vmin.xlane.f32.xlu0 %v1020_v18  ;;  %v998_v20 = vsel %vm990_vm4, %v2769_v63, 2.0  ;;  %vm989_vm5 = vcmp.ge.f32.partialorder %v2745_v43, %v2786_v19  ;;  %v1017_v17 = vsel %vm441_vm11, %v999_v15, inf  ;;  %v2153_v15 = vmul.f32 -1.442695, %v2590_v54 }
 0x3bb   :  { %v1014_v22 = vsel %vm441_vm11, %v998_v20, inf  ;;  %v997_v32 = vsel %vm989_vm5, %v2769_v63, 2.0 }
 0x3bc   :  { %1015 = vmin.xlane.f32.xlu2 %v1014_v22  ;;  %v1011_v34 = vsel %vm441_vm11, %v997_v32, inf  ;;  %v2151_v22 = vmul.f32 -1.442695, %v2604_v59 }
 0x3be   :  { %2364 = vpow2.f32 %v2151_v22 }
 0x3c0   :  { %v2792_v23 = vpop.xlane.xlu0 %960 }
 0x3c1   :  { %v2794_v25 = vpop.xlane.xlu2 %981  ;;  %vm986_vm6 = vcmp.ge.f32.partialorder %v853_v61, %v2792_v23 }
 0x3c2   :  { %vm993_vm8 = vcmp.ge.f32.partialorder %v958_v21, %v2794_v25  ;;  %v994_v29 = vsel %vm986_vm6, %v2769_v63, 2.0 }
 0x3c3   :  { %v1001_v30 = vsel %vm993_vm8, %v2769_v63, 2.0  ;;  %v1002_v24 = vsel %vm441_vm11, %v994_v29, inf }
 0x3c4   :  { %v1023_v31 = vsel %vm441_vm11, %v1001_v30, inf  ;;  %1003 = vmin.xlane.f32.xlu2 %v1002_v24  ;;  %v2152_v30 = vmul.f32 -1.442695, %v2598_v57  ;;  %v2365_v24 = vpop.eup %2364 }
 0x3c5   :  { %1024 = vmin.xlane.f32.xlu1 %v1023_v31  ;;  %v187_v32 = vadd.f32 1.0, %v2365_v24 }
 0x3c6   :  { %2366 = vpow2.f32 %v2152_v30 }
 0x3c7   :  { %2368 = vrcp.f32 %v187_v32  ;;  %vm228_vm6 = vweird.f32 %v187_v32 }
 0x3c9   :  { %v2805_v33 = vpop.xlane.xlu2 %963 }
 0x3ca   :  { %3817 = vst [vmem:[#allocation15_spill] sm:$0xff] %v2805_v33  ;;  %vm987_vm7 = vcmp.ge.f32.partialorder %v868_v12, %v2805_v33 }
 0x3cb   :  { %v995_v35 = vsel %vm987_vm7, %v2769_v63, 2.0 }
 0x3cc   :  { %v1005_v36 = vsel %vm441_vm11, %v995_v35, inf }
 0x3cd   :  { %1012 = vmin.xlane.f32.xlu1 %v1011_v34  ;;  %v2367_v34 = vpop.eup %2366 }
 0x3ce   :  { %373 = vrot.lane.b32.xlu0 %v2811_v27, %s2493_s27 }
 0x3d5   :  { %1006 = vmin.xlane.f32.xlu1 %v1005_v36 }
 0x3d6   :  { %452 = vrot.lane.b32.xlu0 %v2821_v39, %s2494_s9 }
 0x3dc   :  { %450 = vrot.lane.b32.xlu2 %v2811_v27, %s2494_s9 }
 0x3de   :  { %506 = vrot.lane.b32.xlu0 %v2821_v39, %s2495_s6 }
 0x3ee   :  { %375 = vrot.lane.b32.xlu1 %v2821_v39, %s2493_s27 }
 0x3f6   :  { %504 = vrot.lane.b32.xlu1 %v2811_v27, %s2495_s6 }
 0x3ff   :  { %v2831_v40 = vpop.xlane.xlu2 %1009 }
 0x400   :  { %vm1028_vm0 = vcmp.eq.f32.partialorder %v2769_v63, %v2831_v40 }
 0x42d   :  { %v1022_v48 = vpop.xlane.xlu0 %1021 }
 0x42e   :  { %vm1032_vm12 = vcmp.eq.f32.partialorder %v2769_v63, %v1022_v48  ;;  %v188_v48 = vadd.f32 1.0, %v2367_v34 }
 0x42f   :  { %v2833_v42 = vpop.xlane.xlu2 %1015  ;;  %v2838_v62 = vsel %vm1032_vm12, 1.0, %v3780_v45 }
 0x430   :  { %2370 = vrcp.f32 %v188_v48 }
 0x431   :  { %2372 = vpow2.f32 %v2153_v15  ;;  %v2156_v15 = vmul.f32 -1.442695, %v2594_v55 }
 0x437   :  { %v1004_v28 = vpop.xlane.xlu2 %1003 }
 0x438   :  { %v1025_v43 = vpop.xlane.xlu1 %1024  ;;  %vm1026_vm1 = vcmp.eq.f32.partialorder %v2769_v63, %v1004_v28 }
 0x439   :  { %vm1033_vm13 = vcmp.eq.f32.partialorder %v2769_v63, %v1025_v43  ;;  %v2892_v37 = vsel %vm1026_vm1, 1.0, %v3780_v45  ;;  %v2369_v43 = vpop.eup %2368 }
 0x43a   :  { %v2841_v46 = vsel %vm1033_vm13, 1.0, %v3780_v45  ;;  %2185 = vmatpush.msk.msra.mxu1 %vm1033_vm13, %v3782_v47  ;;  %3819 = vst [vmem:[#allocation17_spill] sm:$0xff] %v2892_v37  ;;  %vm229_vm4 = vweird.f32 %v2369_v43 }
 0x43b   :  { %v2848_v53 = vpack.i.bf16 %v2841_v46, %v2838_v62  ;;  %vm230_vm8 = vmor %vm228_vm6, %vm229_vm4 }
 0x43c   :  { %2186 = vmatpush.msk.msra.mxu1 %vm1032_vm12, %v3782_v47  ;;  %vm243_vm12 = vweird.f32 %v188_v48 }
 0x43d   :  { %3818 = vst [vmem:[#allocation16_spill] sm:$0xff] %v2848_v53  ;;  %2187 = vmatmul.msk.f32.vlgmr.msra.gmra.mxu1 %vm1052_vm14, %v2844_v51 }
 0x43f   :  { %v2853_v60 = vpop.permute.xlu2 %450 }
 0x440   :  { %v2855_v58 = vpop.xlane.xlu1 %1012  ;;  %v2857_v26 = vpop.permute.xlu0 %373  ;;  %v2861_v2 = vmul.f32 %v2853_v60, %v2604_v59  ;;  %v2926_v11 = vmul.f32 %v2853_v60, %v2596_v56  ;;  %v2933_v12 = vmul.f32 %v2853_v60, %v2590_v54  ;;  %v2970_v31 = vmul.f32 %v2853_v60, %v2570_v49 }
 0x441   :  { %vm1029_vm15 = vcmp.eq.f32.partialorder %v2769_v63, %v2855_v58  ;;  %v520_v5 = vmul.f32 %v2857_v26, %v2604_v59  ;;  %v518_v14 = vmul.f32 %v2857_v26, %v2570_v49  ;;  %v524_v18 = vmul.f32 %v2857_v26, %v2596_v56 }
 0x442   :  { %2177 = vmatpush.msk.msra.mxu3 %vm1029_vm15, %v3782_v47  ;;  %476 = vrot.lane.b32.xlu2 %v2861_v2, %s2498_s10  ;;  %v522_v20 = vmul.f32 %v2857_v26, %v2590_v54  ;;  %v224_v60 = vmul.f32 %v2369_v43, %v187_v32 }
 0x443   :  { %538 = vrot.lane.b32.xlu0 %v520_v5, %s2493_s27  ;;  %v2371_v5 = vpop.eup %2370 }
 0x444   :  { %2178 = vmatpush.msk.msra.mxu3 %vm1028_vm0, %v3782_v47  ;;  %vm244_vm7 = vweird.f32 %v2371_v5 }
 0x445   :  { %2179 = vmatmul.msk.f32.vlgmr.msra.gmra.mxu3 %vm1052_vm14, %v2844_v51  ;;  %2188 = vmatmul.msk.f32.gmra.mxu1 %vm1052_vm14, %v2873_v6  ;;  %vm245_vm13 = vmor %vm243_vm12, %vm244_vm7 }
 0x448   :  { %v1007_v7 = vpop.xlane.xlu1 %1006  ;;  %v453_v8 = vpop.permute.xlu0 %452 }
 0x449   :  { %vm1027_vm2 = vcmp.eq.f32.partialorder %v2769_v63, %v1007_v7  ;;  %v2889_v21 = vmul.f32 %v453_v8, %v2598_v57  ;;  %v2916_v38 = vmul.f32 %v453_v8, %v2585_v52  ;;  %v2954_v1 = vmul.f32 %v453_v8, %v2573_v50 }
 0x44a   :  { %v2895_v61 = vsel %vm1027_vm2, 1.0, %v3780_v45  ;;  %2173 = vmatpush.msk.msrb.mxu2 %vm1027_vm2, %v3782_v47  ;;  %v2963_v29 = vmul.f32 %v453_v8, %v2594_v55  ;;  %v225_v7 = vsub.f32 1.0, %v224_v60  ;;  %v239_v8 = vmul.f32 %v2371_v5, %v188_v48 }
 0x44b   :  { %3820 = vst [vmem:[#allocation18_spill] sm:$0xff] %v2895_v61  ;;  %v2900_v9 = vpack.i.bf16 %v2895_v61, %v2892_v37  ;;  %389 = vrot.lane.b32.xlu0 %v2821_v39, %s2498_s10  ;;  %478 = vrot.lane.b32.xlu1 %v2889_v21, %s2498_s10  ;;  %v3789_v37 = vmov 1  }
 0x44c   :  { %2174 = vmatpush.msk.msrb.mxu2 %vm1026_vm1, %v3782_v47  ;;  %2239 = vset.pattern.permute.xlu0 %v3789_v37 }
 0x44d   :  { %3821 = vst [vmem:[#allocation19_spill] sm:$0xff] %v2900_v9  ;;  %2175 = vmatmul.msk.f32.vlgmr.msrb.gmra.mxu2 %vm1052_vm14, %v2844_v51  ;;  %2180 = vmatmul.msk.f32.gmra.mxu3 %vm1052_vm14, %v2873_v6 }
 0x44e   :  { %2233 = vset.pattern.permute.xlu2 %v3789_v37  ;;  %2245 = vset.pattern.permute.xlu1 %v3789_v37 }
 0x453   :  { %387 = vrot.lane.b32.xlu1 %v2811_v27, %s2498_s10 }
 0x455   :  { %2176 = vmatmul.msk.f32.gmra.mxu2 %vm1052_vm14, %v2873_v6 }
 0x45b   :  { %482 = vrot.lane.b32.xlu1 %v2916_v38, %s2498_s10 }
 0x460   :  { %v2920_v41 = vpop.permute.xlu1 %375 }
 0x461   :  { %v521_v10 = vmul.f32 %v2920_v41, %v2598_v57  ;;  %v525_v13 = vmul.f32 %v2920_v41, %v2594_v55  ;;  %v523_v44 = vmul.f32 %v2920_v41, %v2585_v52  ;;  %v519_v28 = vmul.f32 %v2920_v41, %v2573_v50 }
 0x463   :  { %540 = vrot.lane.b32.xlu2 %v521_v10, %s2493_s27  ;;  %484 = vrot.lane.b32.xlu1 %v2926_v11, %s2498_s10  ;;  %v2979_v10 = vpop.permute.xlu0 %506 }
 0x46b   :  { %480 = vrot.lane.b32.xlu2 %v2933_v12, %s2498_s10  ;;  %548 = vrot.lane.b32.xlu1 %v525_v13, %s2493_s27  ;;  %v226_v13 = vmul.f32 %v2369_v43, %v225_v7  ;;  %v249_v7 = vand.u32 2147483648, %v188_v48 }
 0x473   :  { %544 = vrot.lane.b32.xlu2 %v523_v44, %s2493_s27  ;;  %534 = vrot.lane.b32.xlu1 %v518_v14, %s2493_s27  ;;  %v240_v44 = vsub.f32 1.0, %v239_v8  ;;  %v227_v14 = vadd.f32 %v2369_v43, %v226_v13  ;;  %v2373_v13 = vpop.eup %2372 }
 0x475   :  { %1018 = vmin.xlane.f32.xlu0 %v1017_v17  ;;  %v234_v17 = vand.u32 2147483648, %v187_v32  ;;  %v241_v30 = vmul.f32 %v2371_v5, %v240_v44  ;;  %v231_v34 = vsel %vm230_vm8, %v2369_v43, %v227_v14  ;;  %v513_v43 = vmul.f32 %v2979_v10, %v2598_v57 }
 0x477   :  { %v242_v60 = vadd.f32 %v2371_v5, %v241_v30 }
 0x479   :  { %v246_v44 = vsel %vm245_vm13, %v2371_v5, %v242_v60 }
 0x47b   :  { %546 = vrot.lane.b32.xlu2 %v524_v18, %s2493_s27  ;;  %v2155_v18 = vmul.f32 -1.442695, %v2596_v56 }
 0x47d   :  { %2374 = vpow2.f32 %v2155_v18 }
 0x47e   :  { %2376 = vpow2.f32 %v2156_v15 }
 0x483   :  { %474 = vrot.lane.b32.xlu2 %v2954_v1, %s2498_s10  ;;  %v2375_v14 = vpop.eup %2374 }
 0x489   :  { %542 = vrot.lane.b32.xlu0 %v522_v20, %s2493_s27  ;;  %v232_v20 = vand.u32 2147483647, %v187_v32  ;;  %v247_v32 = vand.u32 2147483647, %v188_v48  ;;  %v2995_v48 = vadd.f32 1.0, %v2373_v13 }
 0x48b   :  { %vm233_vm5 = vcmp.eq.f32.partialorder %v232_v20, 8.507059e+37  ;;  %v250_v20 = vor.u32 1.1754944e-38, %v249_v7  ;;  %vm248_vm1 = vcmp.eq.f32.partialorder %v247_v32, 8.507059e+37  ;;  %2378 = vrcp.f32 %v2995_v48  ;;  %v2377_v7 = vpop.eup %2376 }
 0x48c   :  { %vm258_vm4 = vweird.f32 %v2995_v48 }
 0x491   :  { %486 = vrot.lane.b32.xlu0 %v2963_v29, %s2498_s10 }
 0x499   :  { %472 = vrot.lane.b32.xlu0 %v2970_v31, %s2498_s10 }
 0x49c   :  { %v477_v35 = vpop.permute.xlu2 %476 }
 0x49d   :  { %v498_v36 = vsub.f32 %v2861_v2, %v477_v35  ;;  %v2981_v2 = vpop.permute.xlu1 %504 }
 0x49e   :  { %v512_v22 = vmul.f32 %v2981_v2, %v2604_v59 }
 0x49f   :  { %578 = vrot.lane.b32.xlu2 %v498_v36, %s2499_s11  ;;  %v235_v36 = vor.u32 1.1754944e-38, %v234_v17 }
 0x4a1   :  { %536 = vrot.lane.b32.xlu0 %v519_v28, %s2493_s27  ;;  %v236_v28 = vsel %vm233_vm5, %v235_v36, %v231_v34  ;;  %v251_v34 = vsel %vm248_vm1, %v250_v20, %v246_v44 }
 0x4a2   :  { %v2989_v8 = vmul.f32 %v236_v28, %v2604_v59 }
 0x4b5   :  { %v539_v24 = vpop.permute.xlu0 %538 }
 0x4b6   :  { %v560_v35 = vadd.f32 %v539_v24, %v512_v22  ;;  %v2999_v24 = vmul.f32 %v2811_v27, %v2989_v8 }
 0x4b8   :  { %610 = vrot.lane.b32.xlu0 %v560_v35, %s2499_s11  ;;  %v3001_v35 = vadd.f32 1.0, %v2375_v14  ;;  %v3028_v14 = vadd.f32 1.0, %v2377_v7 }
 0x4ba   :  { %2380 = vrcp.f32 %v3001_v35  ;;  %vm288_vm8 = vweird.f32 %v3001_v35  ;;  %vm303_vm1 = vweird.f32 %v3028_v14 }
 0x4bb   :  { %2382 = vrcp.f32 %v3028_v14 }
 0x4bd   :  { %v541_v17 = vpop.permute.xlu2 %540  ;;  %v479_v18 = vpop.permute.xlu1 %478 }
 0x4be   :  { %v561_v22 = vadd.f32 %v541_v17, %v513_v43  ;;  %v499_v30 = vsub.f32 %v2889_v21, %v479_v18  ;;  %v3008_v21 = vmul.f32 %v251_v34, %v2598_v57  ;;  %v3012_v5 = vpop.permute.xlu0 %389  ;;  %v2379_v43 = vpop.eup %2378 }
 0x4bf   :  { %v254_v17 = vmul.f32 %v2379_v43, %v2995_v48  ;;  %vm259_vm2 = vweird.f32 %v2379_v43 }
 0x4c0   :  { %612 = vrot.lane.b32.xlu2 %v561_v22, %s2499_s11  ;;  %580 = vrot.lane.b32.xlu1 %v499_v30, %s2499_s11  ;;  %v3018_v28 = vmul.f32 %v2821_v39, %v3008_v21  ;;  %v396_v32 = vmul.f32 %v3012_v5, %v3008_v21  ;;  %v2381_v44 = vpop.eup %2380  ;;  %vm3051_vm6 = vmor %vm258_vm4, %vm259_vm2 }
 0x4c1   :  { %343 = vrot.lane.b32.xlu0 %v2999_v24, %s2498_s10  ;;  %v284_v18 = vmul.f32 %v2381_v44, %v3001_v35  ;;  %v255_v30 = vsub.f32 1.0, %v254_v17  ;;  %v3037_v7 = vpop.eup %2382  ;;  %vm289_vm3 = vweird.f32 %v2381_v44 }
 0x4c2   :  { %vm290_vm5 = vmor %vm288_vm8, %vm289_vm3  ;;  %vm304_vm13 = vweird.f32 %v3037_v7 }
 0x4c3   :  { %v285_v34 = vsub.f32 1.0, %v284_v18  ;;  %v256_v47 = vmul.f32 %v2379_v43, %v255_v30  ;;  %v262_v18 = vand.u32 2147483647, %v2995_v48  ;;  %vm305_vm2 = vmor %vm303_vm1, %vm304_vm13 }
 0x4c5   :  { %v3014_v36 = vpop.permute.xlu1 %387  ;;  %v481_v13 = vpop.permute.xlu2 %480  ;;  %v286_v57 = vmul.f32 %v2381_v44, %v285_v34  ;;  %vm263_vm7 = vcmp.eq.f32.partialorder %v262_v18, 8.507059e+37 }
 0x4c6   :  { %v395_v60 = vmul.f32 %v3014_v36, %v2989_v8  ;;  %v500_v22 = vsub.f32 %v2933_v12, %v481_v13  ;;  %v299_v12 = vmul.f32 %v3037_v7, %v3028_v14  ;;  %v2154_v13 = vmul.f32 -1.442695, %v2585_v52 }
 0x4c7   :  { %v287_v17 = vadd.f32 %v2381_v44, %v286_v57 }
 0x4c8   :  { %345 = vrot.lane.b32.xlu2 %v3018_v28, %s2498_s10  ;;  %413 = vrot.lane.b32.xlu1 %v395_v60, %s2493_s27  ;;  %2384 = vpow2.f32 %v2154_v13 }
 0x4c9   :  { %415 = vrot.lane.b32.xlu0 %v396_v32, %s2493_s27  ;;  %v515_v32 = vmul.f32 %v2979_v10, %v2585_v52 }
 0x4cd   :  { %v483_v15 = vpop.permute.xlu1 %482  ;;  %v545_v60 = vpop.permute.xlu2 %544 }
 0x4ce   :  { %v501_v20 = vsub.f32 %v2916_v38, %v483_v15  ;;  %v563_v59 = vadd.f32 %v545_v60, %v515_v32  ;;  %v257_v15 = vadd.f32 %v2379_v43, %v256_v47  ;;  %v517_v47 = vmul.f32 %v2979_v10, %v2594_v55 }
 0x4cf   :  { %v291_v60 = vsel %vm290_vm5, %v2381_v44, %v287_v17  ;;  %v309_v17 = vand.u32 2147483648, %v3028_v14 }
 0x4d0   :  { %584 = vrot.lane.b32.xlu2 %v501_v20, %s2499_s11  ;;  %v264_v20 = vand.u32 2147483648, %v2995_v48  ;;  %v516_v48 = vmul.f32 %v2981_v2, %v2596_v56  ;;  %v261_v34 = vsel %vm3051_vm6, %v2379_v43, %v257_v15  ;;  %v2385_v43 = vpop.eup %2384  ;;  %vm1030_vm6 = vcmp.eq.f32.partialorder %v2769_v63, %v2833_v42 }
 0x4d1   :  { %582 = vrot.lane.b32.xlu0 %v500_v22, %s2499_s11  ;;  %v292_v22 = vand.u32 2147483647, %v3001_v35  ;;  %v3078_v18 = vadd.f32 1.0, %v2385_v43 }
 0x4d3   :  { %vm293_vm12 = vcmp.eq.f32.partialorder %v292_v22, 8.507059e+37  ;;  %2386 = vrcp.f32 %v3078_v18  ;;  %vm273_vm5 = vweird.f32 %v3078_v18 }
 0x4d5   :  { %v485_v45 = vpop.permute.xlu1 %484  ;;  %v547_v57 = vpop.permute.xlu2 %546 }
 0x4d6   :  { %v502_v38 = vsub.f32 %v2926_v11, %v485_v45  ;;  %v294_v45 = vand.u32 2147483648, %v3001_v35  ;;  %v564_v35 = vadd.f32 %v547_v57, %v516_v48 }
 0x4d8   :  { %586 = vrot.lane.b32.xlu2 %v502_v38, %s2499_s11  ;;  %v265_v38 = vor.u32 1.1754944e-38, %v264_v20  ;;  %v295_v61 = vor.u32 1.1754944e-38, %v294_v45  ;;  %v307_v20 = vand.u32 2147483647, %v3028_v14  ;;  %v2149_v45 = vmul.f32 -1.442695, %v2570_v49 }
 0x4d9   :  { %616 = vrot.lane.b32.xlu0 %v563_v59, %s2499_s11  ;;  %v300_v59 = vsub.f32 1.0, %v299_v12 }
 0x4da   :  { %v266_v13 = vsel %vm263_vm7, %v265_v38, %v261_v34  ;;  %v296_v33 = vsel %vm293_vm12, %v295_v61, %v291_v60  ;;  %vm308_vm4 = vcmp.eq.f32.partialorder %v307_v20, 8.507059e+37  ;;  %2388 = vpow2.f32 %v2149_v45 }
 0x4db   :  { %v301_v12 = vmul.f32 %v3037_v7, %v300_v59  ;;  %v3070_v44 = vmul.f32 %v266_v13, %v2590_v54  ;;  %v3073_v15 = vmul.f32 %v296_v33, %v2596_v56  ;;  %v3092_v59 = vpop.f32.mrf.mxu1  ;;  %v514_v20 = vmul.f32 %v2981_v2, %v2590_v54 }
 0x4dd   :  { %v549_v30 = vpop.permute.xlu1 %548  ;;  %v302_v61 = vadd.f32 %v3037_v7, %v301_v12  ;;  %v3085_v11 = vmul.f32 %v2811_v27, %v3070_v44  ;;  %v3089_v33 = vmul.f32 %v2811_v27, %v3073_v15  ;;  %v3824_v27 = vmov 1.0  }
 0x4de   :  { %v565_v32 = vadd.f32 %v549_v30, %v517_v47  ;;  %v310_v47 = vor.u32 1.1754944e-38, %v309_v17  ;;  %v2387_v30 = vpop.eup %2386  ;;  %v397_v34 = vmul.f32 %v3014_v36, %v3070_v44 }
 0x4df   :  { %v306_v22 = vsel %vm305_vm2, %v3037_v7, %v302_v61  ;;  %v3110_v7 = vmax.f32 %v3092_v59, 1.0  ;;  %v269_v38 = vmul.f32 %v2387_v30, %v3078_v18  ;;  %vm274_vm8 = vweird.f32 %v2387_v30 }
 0x4e0   :  { %620 = vrot.lane.b32.xlu2 %v565_v32, %s2499_s11  ;;  %v311_v14 = vsel %vm308_vm4, %v310_v47, %v306_v22  ;;  %v2389_v32 = vpop.eup %2388  ;;  %vm275_vm7 = vmor %vm273_vm5, %vm274_vm8 }
 0x4e1   :  { %618 = vrot.lane.b32.xlu0 %v564_v35, %s2499_s11  ;;  %v3119_v48 = vmul.f32 %v311_v14, %v2594_v55  ;;  %2390 = vrcp.f32 %v3110_v7  ;;  %v3129_v35 = vadd.f32 1.0, %v2389_v32  ;;  %v270_v13 = vsub.f32 1.0, %v269_v38 }
 0x4e2   :  { %v279_v32 = vand.u32 2147483648, %v3078_v18  ;;  %vm1262_vm12 = vweird.f32 %v3110_v7 }
 0x4e3   :  { %3825 = vst [vmem:[#allocation20_spill] sm:$0xff] %v3119_v48  ;;  %v400_v60 = vmul.f32 %v3012_v5, %v3119_v48  ;;  %v3136_v61 = vmul.f32 %v2821_v39, %v3119_v48  ;;  %2392 = vrcp.f32 %v3129_v35  ;;  %vm198_vm8 = vweird.f32 %v3129_v35 }
 0x4e5   :  { %3826 = vst [vmem:[#allocation21_spill] sm:$0xff] %v3136_v61 }
 0x4e7   :  { %v2391_v12 = vpop.eup %2390 }
 0x4e8   :  { %v3094_v57 = vpop.xlane.xlu0 %1018  ;;  %347 = vrot.lane.b32.xlu2 %v3085_v11, %s2498_s10  ;;  %v1258_v17 = vmul.f32 %v2391_v12, %v3110_v7  ;;  %vm1263_vm13 = vweird.f32 %v2391_v12 }
 0x4e9   :  { %351 = vrot.lane.b32.xlu0 %v3089_v33, %s2498_s10  ;;  %vm1031_vm3 = vcmp.eq.f32.partialorder %v2769_v63, %v3094_v57  ;;  %v2393_v14 = vpop.eup %2392  ;;  %vm3164_vm2 = vmor %vm1262_vm12, %vm1263_vm13 }
 0x4ea   :  { %2181 = vmatpush.msk.msra.mxu0 %vm1031_vm3, %v3824_v27  ;;  %v1259_v22 = vsub.f32 1.0, %v1258_v17  ;;  %vm199_vm4 = vweird.f32 %v2393_v14 }
 0x4eb   :  { %vm200_vm5 = vmor %vm198_vm8, %vm199_vm4 }
 0x4ec   :  { %2182 = vmatpush.msk.msra.mxu0 %vm1030_vm6, %v3824_v27  ;;  %v510_v27 = vmul.f32 %v2981_v2, %v2570_v49  ;;  %v1260_v38 = vmul.f32 %v2391_v12, %v1259_v22  ;;  %v194_v2 = vmul.f32 %v2393_v14, %v3129_v35  ;;  %v3827_v22 = vmov 0.0  }
 0x4ed   :  { %2183 = vmatmul.msk.f32.vlgmr.msra.gmra.mxu0 %vm1052_vm14, %v2844_v51  ;;  %v475_v51 = vpop.permute.xlu2 %474 }
 0x4ee   :  { %v497_v43 = vsub.f32 %v2954_v1, %v475_v51  ;;  %v535_v1 = vpop.permute.xlu1 %534  ;;  %v277_v51 = vand.u32 2147483647, %v3078_v18 }
 0x4f0   :  { %417 = vrot.lane.b32.xlu2 %v397_v34, %s2493_s27  ;;  %vm278_vm1 = vcmp.eq.f32.partialorder %v277_v51, 8.507059e+37 }
 0x4f1   :  { %423 = vrot.lane.b32.xlu0 %v400_v60, %s2493_s27  ;;  %v558_v60 = vadd.f32 %v535_v1, %v510_v27  ;;  %v3162_v1 = vsel %vm1029_vm15, 1.0, %v3827_v22  ;;  %v195_v27 = vsub.f32 1.0, %v194_v2 }
 0x4f5   :  { %2184 = vmatmul.msk.f32.gmra.mxu0 %vm1052_vm14, %v2873_v6  ;;  %v271_v6 = vmul.f32 %v2387_v30, %v270_v13 }
 0x4f7   :  { %v272_v34 = vadd.f32 %v2387_v30, %v271_v6  ;;  %v1261_v6 = vadd.f32 %v2391_v12, %v1260_v38  ;;  %v196_v38 = vmul.f32 %v2393_v14, %v195_v27 }
 0x4f8   :  { %353 = vrot.lane.b32.xlu2 %v3136_v61, %s2498_s10 }
 0x4f9   :  { %576 = vrot.lane.b32.xlu0 %v497_v43, %s2499_s11  ;;  %v276_v13 = vsel %vm275_vm7, %v2387_v30, %v272_v34  ;;  %v1268_v43 = vand.u32 2147483648, %v3110_v7  ;;  %v1265_v34 = vsel %vm3164_vm2, %v2391_v12, %v1261_v6  ;;  %v197_v2 = vadd.f32 %v2393_v14, %v196_v38 }
 0x4fb   :  { %v543_v45 = vpop.permute.xlu0 %542 }
 0x4fc   :  { %v562_v47 = vadd.f32 %v543_v45, %v514_v20  ;;  %v280_v20 = vor.u32 1.1754944e-38, %v279_v32  ;;  %v1266_v45 = vand.u32 2147483647, %v3110_v7  ;;  %v1269_v7 = vor.u32 1.1754944e-38, %v1268_v43 }
 0x4fd   :  { %v3791_v32 = vmov 0   ;;  %v1301_v43 = vmul.f32 %v2838_v62, %v2779_v3 }
 0x4fe   :  { %614 = vrot.lane.b32.xlu1 %v562_v47, %s2499_s11  ;;  %v281_v30 = vsel %vm278_vm1, %v280_v20, %v276_v13  ;;  %vm1267_vm15 = vcmp.eq.f32.partialorder %v1266_v45, 8.507059e+37  ;;  %v204_v13 = vand.u32 2147483648, %v3129_v35  ;;  %v3198_v20 = vpop.permute.xlu2 %578  ;;  %v399_v47 = vmul.f32 %v3014_v36, %v3073_v15 }
 0x4ff   :  { %v1270_v40 = vsel %vm1267_vm15, %v1269_v7, %v1265_v34  ;;  %v511_v34 = vmul.f32 %v2979_v10, %v2573_v50  ;;  %v381_v10 = vmul.f32 %v2857_v26, %v2989_v8 }
 0x500   :  { %606 = vrot.lane.b32.xlu2 %v558_v60, %s2499_s11  ;;  %v3180_v60 = vmul.f32 %v281_v30, %v2585_v52  ;;  %v205_v6 = vor.u32 1.1754944e-38, %v204_v13 }
 0x501   :  { %2241 = vperm.xlu0 %2239, %v2848_v53  }
 0x502   :  { %v3187_v51 = vmul.f32 %v2821_v39, %v3180_v60  ;;  %v201_v39 = vsel %vm200_vm5, %v2393_v14, %v197_v2  ;;  %v398_v45 = vmul.f32 %v3012_v5, %v3180_v60 }
 0x503   :  { %v487_v17 = vpop.permute.xlu0 %486 }
 0x504   :  { %v503_v18 = vsub.f32 %v2963_v29, %v487_v17  ;;  %v3173_v29 = vsel %vm1028_vm0, 1.0, %v3827_v22  ;;  %vm1157_vm0 = vcmp.gt.f32.partialorder %v3092_v59, 0.0  ;;  %v202_v59 = vand.u32 2147483647, %v3129_v35 }
 0x505   :  { %v2257_v58 = vpack.i.bf16 %v3162_v1, %v3173_v29  ;;  %v1293_v12 = vsel %vm1157_vm0, %v1270_v40, 0.0 }
 0x506   :  { %588 = vrot.lane.b32.xlu1 %v503_v18, %s2499_s11  ;;  %v3196_v17 = vmul.f32 %v1301_v43, %v1293_v12  ;;  %vm203_vm7 = vcmp.eq.f32.partialorder %v202_v59, 8.507059e+37  ;;  %v382_v59 = vmul.f32 %v2920_v41, %v3008_v21  ;;  %v383_v21 = vmul.f32 %v2857_v26, %v3070_v44 }
 0x507   :  { %v206_v3 = vsel %vm203_vm7, %v205_v6, %v201_v39  ;;  %v2169_v39 = vsel %vm1030_vm6, 1.0, %v3827_v22 }
 0x508   :  { %2235 = vperm.xlu2 %2233, %v2900_v9   ;;  %3830 = vst [vmem:[#allocation22_spill] sm:$0xff] %v3196_v17  ;;  %v3206_v62 = vmul.f32 %v206_v3, %v2570_v49  ;;  %v3322_v9 = vpop.f32.mrf.mxu2 }
 0x509   :  { %2256 = vset.pattern.permute.xlu0 %v3791_v32 }
 0x50a   :  { %2258 = vperm.xlu0 %2256, %v2257_v58   ;;  %v393_v14 = vmul.f32 %v3014_v36, %v3206_v62 }
 0x50b   :  { %v473_v35 = vpop.permute.xlu0 %472 }
 0x50c   :  { %v496_v7 = vsub.f32 %v2970_v31, %v473_v35  ;;  %v3234_v31 = vsel %vm1031_vm3, 1.0, %v3827_v22 }
 0x50d   :  { %v3248_v3 = vpack.i.bf16 %v3234_v31, %v2169_v39 }
 0x50e   :  { %349 = vrot.lane.b32.xlu1 %v3187_v51, %s2498_s10 }
 0x50f   :  { %3832 = vst [vmem:[#allocation24_spill] sm:$0xff] %v3248_v3 }
 0x512   :  { %2262 = vset.pattern.permute.xlu0 %v3789_v37 }
 0x513   :  { %1384 = vperm.xlu0 %2262, %v3196_v17   ;;  %v537_v30 = vpop.permute.xlu0 %536 }
 0x514   :  { %v559_v2 = vadd.f32 %v537_v30, %v511_v34  ;;  %v3270_v34 = vpop.f32.mrf.mxu1 }
 0x516   :  { %419 = vrot.lane.b32.xlu1 %v398_v45, %s2493_s27 }
 0x51a   :  { %v3210_v18 = vpop.permute.xlu2 %612 }
 0x51b   :  { %409 = vrot.lane.b32.xlu0 %v393_v14, %s2493_s27 }
 0x51c   :  { %2292 = vset.pattern.permute.xlu0 %v3791_v32 }
 0x51e   :  { %421 = vrot.lane.b32.xlu1 %v399_v47, %s2493_s27 }
 0x522   :  { %v346_v27 = vpop.permute.xlu2 %345 }
 0x523   :  { %v366_v8 = vsub.f32 %v3018_v28, %v346_v27 }
 0x526   :  { %574 = vrot.lane.b32.xlu1 %v496_v7, %s2499_s11 }
 0x52a   :  { %v3221_v38 = vpop.permute.xlu2 %584  ;;  %v3223_v40 = vpop.permute.xlu0 %610 }
 0x52e   :  { %608 = vrot.lane.b32.xlu1 %v559_v2, %s2499_s11  ;;  %v3272_v2 = vpop.f32.mrf.mxu3 }
 0x532   :  { %v3226_v36 = vpop.permute.xlu1 %580  ;;  %v3228_v12 = vpop.permute.xlu2 %586 }
 0x533   :  { %3831 = vst [vmem:[#allocation23_spill] sm:$0xff] %v3228_v12  ;;  %v344_v13 = vpop.permute.xlu0 %343 }
 0x536   :  { %2247 = vperm.xlu1 %2245, %v2257_v58   ;;  %v365_v58 = vsub.f32 %v2999_v24, %v344_v13 }
 0x53a   :  { %v414_v43 = vpop.permute.xlu1 %413  ;;  %v3245_v45 = vpop.permute.xlu2 %620 }
 0x53b   :  { %v435_v6 = vadd.f32 %v414_v43, %v381_v10  ;;  %v416_v57 = vpop.permute.xlu0 %415  ;;  %v1166_v10 = vmax.f32 %v3270_v34, 1.0  ;;  %v3279_v43 = vpop.f32.mrf.mxu3 }
 0x53c   :  { %v436_v35 = vadd.f32 %v416_v57, %v382_v59  ;;  %v3283_v59 = vmax.f32 %v3272_v2, 1.0 }
 0x53d   :  { %v3252_v14 = vsel %vm441_vm11, %v365_v58, %v435_v6  ;;  %2394 = vrcp.f32 %v1166_v10  ;;  %v3288_v6 = vmax.f32 %v3279_v43, 1.0  ;;  %vm1277_vm3 = vweird.f32 %v1166_v10 }
 0x53e   :  { %3833 = vst [vmem:[#allocation25_spill] sm:$0xff] %v3252_v14  ;;  %2252 = vperm.xlu1 %2245, %v3248_v3   ;;  %v3256_v63 = vsel %vm441_vm11, %v366_v8, %v436_v35  ;;  %vm1202_vm2 = vweird.f32 %v3283_v59 }
 0x53f   :  { %3834 = vst [vmem:[#allocation26_spill] sm:$0xff] %v3256_v63  ;;  %v1283_v63 = vand.u32 2147483648, %v1166_v10  ;;  %vm1217_vm4 = vweird.f32 %v3288_v6 }
 0x541   :  { %v1284_v48 = vor.u32 1.1754944e-38, %v1283_v63 }
 0x542   :  { %v348_v42 = vpop.permute.xlu2 %347 }
 0x543   :  { %v3258_v24 = vpop.permute.xlu0 %582  ;;  %v367_v28 = vsub.f32 %v3085_v11, %v348_v42  ;;  %v2150_v11 = vmul.f32 -1.442695, %v2573_v50  ;;  %v3285_v58 = vpop.eup %2394 }
 0x544   :  { %3835 = vst [vmem:[#allocation27_spill] sm:$0xff] %v3258_v24  ;;  %v1273_v57 = vmul.f32 %v3285_v58, %v1166_v10  ;;  %vm1278_vm6 = vweird.f32 %v3285_v58 }
 0x545   :  { %2396 = vpow2.f32 %v2150_v11  ;;  %vm3325_vm12 = vmor %vm1277_vm3, %vm1278_vm6 }
 0x546   :  { %2398 = vrcp.f32 %v3283_v59 }
 0x547   :  { %2400 = vrcp.f32 %v3288_v6 }
 0x54a   :  { %v418_v22 = vpop.permute.xlu2 %417 }
 0x54b   :  { %v3262_v47 = vpop.permute.xlu0 %616  ;;  %v437_v30 = vadd.f32 %v418_v22, %v383_v21  ;;  %v1274_v21 = vsub.f32 1.0, %v1273_v57  ;;  %v2397_v22 = vpop.eup %2396 }
 0x54c   :  { %v3307_v55 = vadd.f32 1.0, %v2397_v22  ;;  %v1299_v22 = vmul.f32 %v2169_v39, %v2783_v0 }
 0x54d   :  { %v3266_v27 = vsel %vm441_vm11, %v367_v28, %v437_v30  ;;  %v3298_v28 = vpop.eup %2398  ;;  %v1275_v37 = vmul.f32 %v3285_v58, %v1274_v21 }
 0x54e   :  { %3836 = vst [vmem:[#allocation28_spill] sm:$0xff] %v3266_v27  ;;  %v3302_v11 = vpop.eup %2400  ;;  %v1281_v27 = vand.u32 2147483647, %v1166_v10  ;;  %v1198_v14 = vmul.f32 %v3298_v28, %v3283_v59  ;;  %vm1203_vm15 = vweird.f32 %v3298_v28 }
 0x54f   :  { %v1213_v21 = vmul.f32 %v3302_v11, %v3288_v6  ;;  %v1276_v54 = vadd.f32 %v3285_v58, %v1275_v37  ;;  %vm1218_vm8 = vweird.f32 %v3302_v11 }
 0x550   :  { %vm3329_vm13 = vcmp.eq.f32.partialorder %v1281_v27, 8.507059e+37  ;;  %v1199_v53 = vsub.f32 1.0, %v1198_v14  ;;  %v3339_v27 = vmax.f32 %v3322_v9, 1.0 }
 0x551   :  { %v1214_v12 = vsub.f32 1.0, %v1213_v21  ;;  %v1280_v14 = vsel %vm3325_vm12, %v3285_v58, %v1276_v54  ;;  %vm1158_vm12 = vcmp.gt.f32.partialorder %v3270_v34, 0.0 }
 0x552   :  { %v1200_v21 = vmul.f32 %v3298_v28, %v1199_v53 }
 0x553   :  { %v3268_v7 = vpop.permute.xlu0 %618  ;;  %v1215_v24 = vmul.f32 %v3302_v11, %v1214_v12 }
 0x554   :  { %3837 = vst [vmem:[#allocation29_spill] sm:$0xff] %v3268_v7  ;;  %v1208_v7 = vand.u32 2147483648, %v3283_v59 }
 0x55b   :  { %v3274_v13 = vpop.permute.xlu0 %351 }
 0x563   :  { %v3277_v44 = vpop.permute.xlu0 %423 }
 0x564   :  { %3838 = vst [vmem:[#allocation30_spill] sm:$0xff] %v3277_v44 }
 0x56a   :  { %v3292_v8 = vpop.f32.mrf.mxu0 }
 0x56b   :  { %v1163_v35 = vmax.f32 %v3292_v8, 1.0  ;;  %v3296_v42 = vpop.permute.xlu0 %576  ;;  %vm1155_vm3 = vcmp.gt.f32.partialorder %v3292_v8, 0.0 }
 0x56d   :  { %2402 = vrcp.f32 %v1163_v35  ;;  %v1238_v17 = vand.u32 2147483648, %v1163_v35  ;;  %v1236_v37 = vand.u32 2147483647, %v1163_v35  ;;  %vm1232_vm0 = vweird.f32 %v1163_v35 }
 0x56f   :  { %v1239_v3 = vor.u32 1.1754944e-38, %v1238_v17  ;;  %vm1237_vm7 = vcmp.eq.f32.partialorder %v1236_v37, 8.507059e+37  ;;  %v3362_v17 = vsel %vm441_vm11, %v3226_v36, %v3210_v18  ;;  %v1302_v36 = vmul.f32 %v2841_v46, %v2794_v25 }
 0x570   :  { %v3300_v30 = vpop.permute.xlu1 %614  ;;  %v1221_v46 = vand.u32 2147483647, %v3288_v6 }
 0x571   :  { %3839 = vst [vmem:[#allocation31_spill] sm:$0xff] %v3300_v30  ;;  %v3357_v30 = vsel %vm441_vm11, %v3198_v20, %v3223_v40  ;;  %v1223_v20 = vand.u32 2147483648, %v3288_v6 }
 0x572   :  { %v3305_v32 = vpop.f32.mrf.mxu0 }
 0x573   :  { %v2403_v56 = vpop.eup %2402  ;;  %v3312_v57 = vmax.f32 %v3305_v32, 1.0  ;;  %v3314_v49 = vpop.permute.xlu0 %2241 }
 0x574   :  { %3840 = vst [vmem:[#allocation32_spill] sm:$0xff] %v3314_v49  ;;  %v1228_v52 = vmul.f32 %v2403_v56, %v1163_v35  ;;  %vm1233_vm1 = vweird.f32 %v2403_v56 }
 0x575   :  { %2404 = vrcp.f32 %v3312_v57  ;;  %vm1234_vm5 = vmor %vm1232_vm0, %vm1233_vm1 }
 0x576   :  { %v1229_v61 = vsub.f32 1.0, %v1228_v52  ;;  %2406 = vrcp.f32 %v3307_v55  ;;  %v1206_v52 = vand.u32 2147483647, %v3283_v59  ;;  %vm3385_vm1 = vmor %vm1202_vm2, %vm1203_vm15  ;;  %v1209_v59 = vor.u32 1.1754944e-38, %v1208_v7 }
 0x577   :  { %vm3395_vm0 = vmor %vm1217_vm4, %vm1218_vm8  ;;  %2408 = vrcp.f32 %v3339_v27  ;;  %vm1156_vm8 = vcmp.gt.f32.partialorder %v3305_v32, 0.0 }
 0x578   :  { %v1230_v0 = vmul.f32 %v2403_v56, %v1229_v61  ;;  %v3333_v39 = vpop.permute.xlu1 %588  ;;  %vm3401_vm2 = vcmp.eq.f32.partialorder %v1206_v52, 8.507059e+37 }
 0x57a   :  { %v1231_v61 = vadd.f32 %v2403_v56, %v1230_v0 }
 0x57b   :  { %v2405_v63 = vpop.eup %2404 }
 0x57c   :  { %v3349_v49 = vpop.eup %2406  ;;  %v1235_v44 = vsel %vm1234_vm5, %v2403_v56, %v1231_v61  ;;  %v1243_v54 = vmul.f32 %v2405_v63, %v3312_v57  ;;  %v2259_v58 = vpop.permute.xlu0 %2258  ;;  %v1253_v61 = vand.u32 2147483648, %v3312_v57  ;;  %vm1248_vm6 = vweird.f32 %v2405_v63 }
 0x57d   :  { %v1240_v35 = vsel %vm1237_vm7, %v1239_v3, %v1235_v44  ;;  %v2261_v53 = vunpack.i.h.bf16 %v2259_v58  ;;  %v2260_v0 = vunpack.i.l.bf16 %v2259_v58  ;;  %v1251_v44 = vand.u32 2147483647, %v3312_v57 }
 0x57e   :  { %v1291_v56 = vsel %vm1155_vm3, %v1240_v35, 0.0  ;;  %v1244_v12 = vsub.f32 1.0, %v1243_v54  ;;  %v1201_v54 = vadd.f32 %v3298_v28, %v1200_v21  ;;  %v1216_v35 = vadd.f32 %v3302_v11, %v1215_v24 }
 0x57f   :  { %v3364_v37 = vmul.f32 %v1299_v22, %v1291_v56  ;;  %v3368_v3 = vmul.f32 %v2261_v53, %v3362_v17  ;;  %v3371_v8 = vmul.f32 %v2260_v0, %v3357_v30  ;;  %v1285_v22 = vsel %vm3329_vm13, %v1284_v48, %v1280_v14 }
 0x580   :  { %v1245_v40 = vmul.f32 %v2405_v63, %v1244_v12  ;;  %v350_v18 = vpop.permute.xlu1 %349  ;;  %vm1247_vm13 = vweird.f32 %v3312_v57  ;;  %v1254_v24 = vor.u32 1.1754944e-38, %v1253_v61  ;;  %v1294_v10 = vsel %vm1158_vm12, %v1285_v22, 0.0 }
 0x581   :  { %1376 = vperm.xlu2 %2233, %v3364_v37   ;;  %vm1249_vm15 = vmor %vm1247_vm13, %vm1248_vm6  ;;  %v1224_v14 = vor.u32 1.1754944e-38, %v1223_v20  ;;  %vm1252_vm4 = vcmp.eq.f32.partialorder %v1251_v44, 8.507059e+37  ;;  %v1205_v6 = vsel %vm3385_vm1, %v3298_v28, %v1201_v54  ;;  %v1300_v57 = vmul.f32 %v3234_v31, %v2777_v16  ;;  %v2409_v31 = vpop.eup %2408 }
 0x582   :  { %v1246_v48 = vadd.f32 %v2405_v63, %v1245_v40  ;;  %v1220_v7 = vsel %vm3395_vm0, %v3302_v11, %v1216_v35  ;;  %vm1222_vm5 = vcmp.eq.f32.partialorder %v1221_v46, 8.507059e+37  ;;  %v3416_v0 = vmul.f32 %v1302_v36, %v1294_v10 }
 0x583   :  { %v384_v56 = vmul.f32 %v2920_v41, %v3180_v60  ;;  %v209_v28 = vmul.f32 %v3349_v49, %v3307_v55  ;;  %vm1153_vm7 = vcmp.gt.f32.partialorder %v3272_v2, 0.0  ;;  %v1210_v16 = vsel %vm3401_vm2, %v1209_v59, %v1205_v6 }
 0x584   :  { %v1250_v21 = vsel %vm1249_vm15, %v2405_v63, %v1246_v48  ;;  %vm1154_vm3 = vcmp.gt.f32.partialorder %v3279_v43, 0.0  ;;  %v1225_v11 = vsel %vm1222_vm5, %v1224_v14, %v1220_v7  ;;  %v368_v12 = vsub.f32 %v3187_v51, %v350_v18  ;;  %v3439_v51 = vpop.permute.xlu2 %353  ;;  %v2430_v48 = vld [vmem:[%s3777_s5] sm:$0xff] }
 0x585   :  { %v1255_v52 = vsel %vm1252_vm4, %v1254_v24, %v1250_v21  ;;  %v210_v60 = vsub.f32 1.0, %v209_v28  ;;  %v1289_v2 = vsel %vm1153_vm7, %v1210_v16, 0.0  ;;  %v1290_v40 = vsel %vm1154_vm3, %v1225_v11, 0.0 }
 0x586   :  { %v1292_v53 = vsel %vm1156_vm8, %v1255_v52, 0.0  ;;  %v1297_v44 = vmul.f32 %v3173_v29, %v2771_v4  ;;  %v1298_v43 = vmul.f32 %v3162_v1, %v2786_v19  ;;  %v1168_v36 = vmul.f32 %v2409_v31, %v3339_v27 }
 0x587   :  { %v3418_v63 = vmul.f32 %v1300_v57, %v1292_v53  ;;  %v385_v54 = vmul.f32 %v2857_v26, %v3073_v15  ;;  %v211_v58 = vmul.f32 %v3349_v49, %v210_v60  ;;  %v369_v4 = vsub.f32 %v3089_v33, %v3274_v13  ;;  %v3482_v53 = vpop.f32.mrf.mxu2 }
 0x588   :  { %v420_v32 = vpop.permute.xlu1 %419  ;;  %v3441_v18 = vmul.f32 %v1297_v44, %v1289_v2  ;;  %v3443_v22 = vmul.f32 %v1298_v43, %v1290_v40  ;;  %v1169_v19 = vsub.f32 1.0, %v1168_v36  ;;  %vm214_vm6 = vweird.f32 %v3349_v49 }
 0x589   :  { %v438_v61 = vadd.f32 %v420_v32, %v384_v56  ;;  %1388 = vperm.xlu2 %2233, %v3416_v0   ;;  %1380 = vperm.xlu1 %2245, %v3418_v63   ;;  %v212_v25 = vadd.f32 %v3349_v49, %v211_v58  ;;  %v219_v15 = vand.u32 2147483648, %v3307_v55  ;;  %vm213_vm12 = vweird.f32 %v3307_v55 }
 0x58a   :  { %v217_v46 = vand.u32 2147483647, %v3307_v55  ;;  %v1170_v33 = vmul.f32 %v2409_v31, %v1169_v19  ;;  %vm3460_vm1 = vmor %vm213_vm12, %vm214_vm6  ;;  %v3468_v34 = vmul.f32 %v2430_v48, %v3206_v62  ;;  %vm1172_vm0 = vweird.f32 %v3339_v27  ;;  %v3856_v19 = vld [vmem:[#allocation27_spill] sm:$0xff] }
 0x58b   :  { %v3432_v20 = vsel %vm441_vm11, %v368_v12, %v438_v61  ;;  %v216_v59 = vsel %vm3460_vm1, %v3349_v49, %v212_v25  ;;  %vm1173_vm13 = vweird.f32 %v2409_v31  ;;  %v220_v10 = vor.u32 1.1754944e-38, %v219_v15  ;;  %v3857_v15 = vld [vmem:[#allocation32_spill] sm:$0xff] }
 0x58c   :  { %v607_v55 = vpop.permute.xlu2 %606  ;;  %v1178_v14 = vand.u32 2147483648, %v3339_v27  ;;  %vm218_vm2 = vcmp.eq.f32.partialorder %v217_v46, 8.507059e+37  ;;  %v3853_v6 = vmov 0   ;;  %v1171_v57 = vadd.f32 %v2409_v31, %v1170_v33  ;;  %vm1174_vm15 = vmor %vm1172_vm0, %vm1173_vm13 }
 0x58d   :  { %v1176_v49 = vand.u32 2147483647, %v3339_v27  ;;  %v221_v52 = vsel %vm218_vm2, %v220_v10, %v216_v59  ;;  %v1160_v32 = vmax.f32 %v3482_v53, 1.0  ;;  %vm1151_vm8 = vcmp.gt.f32.partialorder %v3322_v9, 0.0  ;;  %v2431_v10 = vld [vmem:[%s3777_s5 + $0x8] sm:$0xff]  ;;  %s2503_s5 = smov 16  }
 0x58e   :  { %v1179_v7 = vor.u32 1.1754944e-38, %v1178_v14  ;;  %v3485_v56 = vmul.f32 %v221_v52, %v2573_v50  ;;  %v1175_v28 = vsel %vm1174_vm15, %v2409_v31, %v1171_v57  ;;  %v3854_v31 = vld [vmem:[#allocation17_spill] sm:$0xff]  ;;  %v2244_v46 = vunpack.i.h.bf16 %v3857_v15 }
 0x58f   :  { %vm1177_vm4 = vcmp.eq.f32.partialorder %v1176_v49, 8.507059e+37  ;;  %2410 = vrcp.f32 %v1160_v32  ;;  %v1295_v60 = vmul.f32 %v3854_v31, %v2792_v23  ;;  %v3507_v23 = vsel %vm441_vm11, %v3333_v39, %v3245_v45  ;;  %v3858_v45 = vld [vmem:[#allocation24_spill] sm:$0xff] }
 0x590   :  { %v422_v35 = vpop.permute.xlu1 %421  ;;  %v394_v16 = vmul.f32 %v3012_v5, %v3485_v56  ;;  %v1180_v12 = vsel %vm1177_vm4, %v1179_v7, %v1175_v28  ;;  %v2243_v33 = vunpack.i.l.bf16 %v3857_v15  ;;  %v1535_v48 = vmul.f32 %v2244_v46, %v3507_v23  ;;  %v3870_v15 = vld [vmem:[#allocation14_spill] sm:$0xff] }
 0x591   :  { %v439_v29 = vadd.f32 %v422_v35, %v385_v54  ;;  %1368 = vperm.xlu2 %2233, %v3441_v18   ;;  %1372 = vperm.xlu1 %2245, %v3443_v22   ;;  %v1287_v61 = vsel %vm1151_vm8, %v1180_v12, 0.0  ;;  %v3535_v14 = vmul.f32 %v2431_v10, %v3485_v56  ;;  %vm1187_vm5 = vweird.f32 %v1160_v32 }
 0x592   :  { %v3498_v2 = vmul.f32 %v1295_v60, %v1287_v61  ;;  %v1193_v49 = vand.u32 2147483648, %v1160_v32  ;;  %v1191_v28 = vand.u32 2147483647, %v1160_v32  ;;  %vm1152_vm12 = vcmp.gt.f32.partialorder %v3482_v53, 0.0  ;;  %v3861_v61 = vld [vmem:[#allocation22_spill] sm:$0xff]  ;;  %v3862_v60 = vld [vmem:[#allocation15_spill] sm:$0xff] }
 0x593   :  { %v3453_v1 = vsel %vm441_vm11, %v369_v4, %v439_v29  ;;  %v3866_v53 = vld [vmem:[#allocation20_spill] sm:$0xff]  ;;  %v1730_v46 = vpack.c.bf16 %v3870_v15, %v3870_v15  ;;  %v1729_v10 = vpack.c.bf16 %v2573_v50, %v2573_v50  ;;  %vm1431_vm1 = vcmask 31744  }
 0x594   :  { %vm1192_vm6 = vcmp.eq.f32.partialorder %v1191_v28, 8.507059e+37 }
 0x595   :  { %v2411_v9 = vpop.eup %2410 }
 0x596   :  { %v1183_v36 = vmul.f32 %v2411_v9, %v1160_v32  ;;  %vm1188_vm7 = vweird.f32 %v2411_v9 }
 0x597   :  { %vm1189_vm3 = vmor %vm1187_vm5, %vm1188_vm7 }
 0x598   :  { %v575_v24 = vpop.permute.xlu1 %574  ;;  %v1184_v35 = vsub.f32 1.0, %v1183_v36 }
 0x599   :  { %v3476_v21 = vsel %vm441_vm11, %v575_v24, %v607_v55  ;;  %339 = vrot.lane.b32.xlu2 %v3468_v34, %s2498_s10  ;;  %2268 = vset.pattern.permute.xlu1 %v3853_v6 }
 0x59a   :  { %v1185_v59 = vmul.f32 %v2411_v9, %v1184_v35  ;;  %v1385_v35 = vpop.permute.xlu0 %1384 }
 0x59c   :  { %v1186_v7 = vadd.f32 %v2411_v9, %v1185_v59 }
 0x5a0   :  { %v609_v11 = vpop.permute.xlu1 %608 }
 0x5a1   :  { %v3493_v27 = vsel %vm441_vm11, %v3296_v42, %v609_v11  ;;  %411 = vrot.lane.b32.xlu2 %v394_v16, %s2493_s27  ;;  %v1194_v16 = vor.u32 1.1754944e-38, %v1193_v49  ;;  %v1190_v11 = vsel %vm1189_vm3, %v2411_v9, %v1186_v7  ;;  %v3865_v9 = vld [vmem:[#allocation16_spill] sm:$0xff] }
 0x5a2   :  { %v3874_v49 = vld [vmem:[#allocation8_spill] sm:$0xff] }
 0x5a3   :  { %v1195_v12 = vsel %vm1192_vm6, %v1194_v16, %v1190_v11 }
 0x5a4   :  { %v1288_v31 = vsel %vm1152_vm12, %v1195_v12, 0.0 }
 0x5a8   :  { %v2248_v5 = vpop.permute.xlu1 %2247 }
 0x5a9   :  { %v2250_v40 = vunpack.i.h.bf16 %v2248_v5  ;;  %v2249_v44 = vunpack.i.l.bf16 %v2248_v5  ;;  %1360 = vperm.xlu2 %2233, %v3498_v2   ;;  %v3863_v5 = vld [vmem:[#allocation18_spill] sm:$0xff] }
 0x5ab   :  { %v1531_v43 = vmul.f32 %v2250_v40, %v3362_v17  ;;  %v1530_v42 = vmul.f32 %v2249_v44, %v3357_v30  ;;  %v3513_v17 = vsel %vm441_vm11, %v3221_v38, %v3262_v47  ;;  %v3855_v30 = vld [vmem:[#allocation31_spill] sm:$0xff]  ;;  %v3859_v38 = vld [vmem:[#allocation29_spill] sm:$0xff]  ;;  %v1296_v40 = vmul.f32 %v3863_v5, %v3862_v60  ;;  %v3876_v60 = vld [vmem:[#allocation26_spill] sm:$0xff] }
 0x5ac   :  { %v3518_v25 = vsel %vm441_vm11, %v3856_v19, %v3855_v30  ;;  %v3860_v47 = vld [vmem:[#allocation23_spill] sm:$0xff]  ;;  %v3864_v44 = vmov 1  }
 0x5ad   :  { %v2263_v54 = vpack.i.bf16 %v1531_v43, %v1530_v42  ;;  %v3529_v55 = vsel %vm441_vm11, %v3860_v47, %v3859_v38  ;;  %v1304_v32 = vmul.f32 %v1296_v40, %v1288_v31  ;;  %v386_v43 = vmul.f32 %v2920_v41, %v3866_v53  ;;  %v3867_v42 = vld [vmem:[#allocation30_spill] sm:$0xff]  ;;  %v3869_v19 = vld [vmem:[#allocation19_spill] sm:$0xff]  ;;  %v3877_v53 = vld [vmem:[#allocation28_spill] sm:$0xff] }
 0x5ae   :  { %v1534_v57 = vmul.f32 %v2243_v33, %v3529_v55  ;;  %v3872_v33 = vld [vmem:[#allocation13_spill] sm:$0xff] }
 0x5af   :  { %2264 = vrot.lane.b32.xlu1 %v2263_v54, %s2494_s9  ;;  %v440_v36 = vadd.f32 %v3867_v42, %v386_v43  ;;  %v3868_v54 = vld [vmem:[#allocation21_spill] sm:$0xff] }
 0x5b0   :  { %v2253_v58 = vpop.permute.xlu1 %2252  ;;  %v2287_v52 = vpack.i.bf16 %v1535_v48, %v1534_v57  ;;  %v1773_v48 = vunpack.c.l.b16 %v1730_v46 }
 0x5b1   :  { %v2255_v4 = vunpack.i.h.bf16 %v2253_v58  ;;  %v2254_v29 = vunpack.i.l.bf16 %v2253_v58  ;;  %2270 = vset.pattern.permute.xlu2 %v3853_v6  ;;  %v370_v58 = vsub.f32 %v3868_v54, %v3439_v51  ;;  %v3871_v51 = vld [vmem:[#allocation10_spill] sm:$0xff] }
 0x5b2   :  { %2272 = vperm.xlu2 %2270, %v3858_v45   ;;  %v1731_v45 = vpack.c.bf16 %v3872_v33, %v3872_v33 }
 0x5b3   :  { %v1532_v39 = vmul.f32 %v2254_v29, %v3518_v25  ;;  %v1533_v13 = vmul.f32 %v2255_v4, %v3513_v17  ;;  %v1397_v29 = vmul.f32 %v1385_v35, %v3453_v1 }
 0x5b4   :  { %v1774_v38 = vunpack.c.l.b16 %v1731_v45 }
 0x5b5   :  { %v2282_v24 = vpack.i.bf16 %v1533_v13, %v1532_v39  ;;  %v3873_v39 = vld [vmem:[#allocation9_spill] sm:$0xff] }
 0x5b6   :  { %v1733_v13 = vpack.c.bf16 %v3873_v39, %v3873_v39 }
 0x5b7   :  { %2283 = vrot.lane.b32.xlu0 %v2282_v24, %s2494_s9  ;;  %341 = vrot.lane.b32.xlu1 %v3535_v14, %s2498_s10  ;;  %v1775_v24 = vpack.c.b16 %v1774_v38, %v1773_v48 }
 0x5b8   :  { %v1804_v47 = vunpack.c.l.b16 %v1733_v13 }
 0x5ba   :  { %2288 = vrot.lane.b32.xlu2 %v2287_v52, %s2494_s9  ;;  %v1744_v52 = vunpack.c.l.b16 %v1729_v10 }
 0x5bf   :  { %1328 = vperm.xlu0 %2292, %v3443_v22   ;;  %1323 = vperm.xlu1 %2268, %v3441_v18   ;;  %v2236_v22 = vpop.permute.xlu2 %2235 }
 0x5c2   :  { %1343 = vperm.xlu2 %2270, %v3861_v61   ;;  %v3875_v61 = vld [vmem:[#allocation25_spill] sm:$0xff] }
 0x5c7   :  { %2269 = vset.pattern.permute.xlu1 %v3864_v44 }
 0x5c8   :  { %1364 = vperm.xlu1 %2269, %v1304_v32  }
 0x5d0   :  { %2276 = vset.pattern.permute.xlu1 %v3853_v6  ;;  %v3559_v6 = vsel %vm441_vm11, %v370_v58, %v440_v36  ;;  %v2238_v36 = vunpack.i.h.bf16 %v2236_v22  ;;  %v2237_v58 = vunpack.i.l.bf16 %v2236_v22 }
 0x5d1   :  { %2278 = vperm.xlu1 %2276, %v3865_v9  }
 0x5d2   :  { %v1529_v35 = vmul.f32 %v2238_v36, %v3493_v27 }
 0x5d9   :  { %1333 = vperm.xlu1 %2276, %v3364_v37  }
 0x5db   :  { %v1377_v18 = vpop.permute.xlu2 %1376 }
 0x5dc   :  { %v1395_v43 = vmul.f32 %v1377_v18, %v3877_v53 }
 0x5e1   :  { %1348 = vperm.xlu1 %2276, %v3416_v0   ;;  %v1732_v0 = vpack.c.bf16 %v3871_v51, %v3871_v51 }
 0x5e3   :  { %v1389_v4 = vpop.permute.xlu2 %1388  ;;  %v1803_v59 = vunpack.c.l.b16 %v1732_v0 }
 0x5e4   :  { %v1398_v37 = vmul.f32 %v1389_v4, %v3559_v6  ;;  %v1528_v4 = vmul.f32 %v2237_v58, %v3476_v21 }
 0x5e5   :  { %v1805_v57 = vpack.c.b16 %v1804_v47, %v1803_v59 }
 0x5e6   :  { %v2303_v30 = vpack.i.bf16 %v1398_v37, %v1397_v29  ;;  %v2313_v29 = vpack.i.bf16 %v1529_v35, %v1528_v4  ;;  %v3878_v4 = vld [vmem:[#allocation12_spill] sm:$0xff] }
 0x5e8   :  { %2304 = vrot.lane.b32.xlu2 %v2303_v30, %s2494_s9 }
 0x5e9   :  { %2309 = vperm.xlu1 %2276, %v3869_v19  }
 0x5eb   :  { %v1369_v7 = vpop.permute.xlu2 %1368 }
 0x5ec   :  { %v1393_v31 = vmul.f32 %v1369_v7, %v3875_v61 }
 0x5f0   :  { %1313 = vperm.xlu2 %2270, %v3498_v2   ;;  %v1728_v2 = vpack.c.bf16 %v3874_v49, %v3874_v49 }
 0x5f1   :  { %1318 = vperm.xlu1 %2276, %v1304_v32  }
 0x5f2   :  { %v1743_v16 = vunpack.c.l.b16 %v1728_v2 }
 0x5f3   :  { %v340_v5 = vpop.permute.xlu2 %339 }
 0x5f4   :  { %v1745_v11 = vpack.c.b16 %v1744_v52, %v1743_v16 }
 0x5f8   :  { %1776 = vrot.lane.b32.xlu2 %v1775_v24, %s2492_s17 }
 0x5f9   :  { %1806 = vrot.lane.b32.xlu1 %v1805_v57, %s2492_s17 }
 0x5fb   :  { %v1381_v28 = vpop.permute.xlu1 %1380  ;;  %v412_v32 = vpop.permute.xlu2 %411 }
 0x5fc   :  { %v1396_v9 = vmul.f32 %v1381_v28, %v3432_v20 }
 0x5fe   :  { %v2298_v42 = vpack.i.bf16 %v1396_v9, %v1395_v43 }
 0x600   :  { %1746 = vrot.lane.b32.xlu2 %v1745_v11, %s2492_s17  ;;  %v363_v11 = vsub.f32 %v3468_v34, %v340_v5  ;;  %v1734_v34 = vpack.c.bf16 %v3878_v4, %v3878_v4 }
 0x602   :  { %v1833_v5 = vunpack.c.l.b16 %v1734_v34 }
 0x603   :  { %v1373_v12 = vpop.permute.xlu1 %1372  ;;  %v1361_v54 = vpop.permute.xlu2 %1360 }
 0x604   :  { %v1394_v50 = vmul.f32 %v1373_v12, %v3876_v60  ;;  %v380_v12 = vmul.f32 %v2920_v41, %v3485_v56  ;;  %v3879_v41 = vld [vmem:[#allocation11_spill] sm:$0xff] }
 0x606   :  { %v2293_v40 = vpack.i.bf16 %v1394_v50, %v1393_v31 }
 0x608   :  { %2294 = vrot.lane.b32.xlu0 %v2293_v40, %s2494_s9  ;;  %v434_v40 = vadd.f32 %v412_v32, %v380_v12 }
 0x60c   :  { %v2273_v19 = vpop.permute.xlu2 %2272 }
 0x60d   :  { %v2275_v51 = vunpack.i.h.bf16 %v2273_v19  ;;  %v2274_v0 = vunpack.i.l.bf16 %v2273_v19 }
 0x60f   :  { %v1493_v59 = vmul.f32 %v2275_v51, %v3513_v17  ;;  %v1492_v38 = vmul.f32 %v2274_v0, %v3518_v25  ;;  %v379_v25 = vmul.f32 %v2857_v26, %v3206_v62 }
 0x610   :  { %1338 = vperm.xlu0 %2292, %v3418_v63   ;;  %v410_v63 = vpop.permute.xlu0 %409 }
 0x611   :  { %v433_v50 = vadd.f32 %v410_v63, %v379_v25 }
 0x613   :  { %v3611_v9 = vsel %vm441_vm11, %v363_v11, %v433_v50 }
 0x614   :  { %v2289_v7 = vpop.permute.xlu2 %2288  ;;  %v1391_v58 = vmul.f32 %v1361_v54, %v3611_v9 }
 0x615   :  { %v2291_v19 = vunpack.i.h.bf16 %v2289_v7 }
 0x618   :  { %2299 = vrot.lane.b32.xlu0 %v2298_v42, %s2494_s9 }
 0x619   :  { %2323 = vset.pattern.permute.xlu0 %v3864_v44 }
 0x61c   :  { %v1344_v43 = vpop.permute.xlu2 %1343 }
 0x620   :  { %2314 = vrot.lane.b32.xlu0 %v2313_v29, %s2494_s9 }
 0x621   :  { %v2265_v37 = vpop.permute.xlu1 %2264 }
 0x622   :  { %v2267_v30 = vunpack.i.h.bf16 %v2265_v37  ;;  %v2266_v18 = vunpack.i.l.bf16 %v2265_v37 }
 0x624   :  { %v1570_v15 = vsel %vm1431_vm1, %v3371_v8, %v2266_v18  ;;  %v1571_v44 = vsel %vm1431_vm1, %v3368_v3, %v2267_v30 }
 0x625   :  { %v1578_v22 = vpack.c.bf16 %v1570_v15, %v1570_v15  ;;  %v1579_v46 = vpack.c.bf16 %v1571_v44, %v1571_v44  ;;  %v2290_v15 = vunpack.i.l.bf16 %v2289_v7 }
 0x627   :  { %v1621_v33 = vunpack.c.l.b16 %v1578_v22  ;;  %v1622_v45 = vunpack.c.l.b16 %v1579_v46 }
 0x629   :  { %v2284_v39 = vpop.permute.xlu0 %2283  ;;  %v342_v13 = vpop.permute.xlu1 %341  ;;  %v1623_v48 = vpack.c.b16 %v1622_v45, %v1621_v33 }
 0x62a   :  { %v2286_v47 = vunpack.i.h.bf16 %v2284_v39  ;;  %v2285_v24 = vunpack.i.l.bf16 %v2284_v39  ;;  %v364_v31 = vsub.f32 %v3535_v14, %v342_v13  ;;  %v1735_v14 = vpack.c.bf16 %v3879_v41, %v3879_v41 }
 0x62b   :  { %v1628_v8 = vsel %vm646_vm10, %v1623_v48, 0 }
 0x62c   :  { %v1572_v10 = vsel %vm1431_vm1, %v1492_v38, %v2285_v24  ;;  %v1573_v3 = vsel %vm1431_vm1, %v1493_v59, %v2286_v47  ;;  %1637 = vmatpush.bf16.xpose.msrb.mxu3 %v1628_v8  ;;  %v443_v42 = vsel %vm441_vm11, %v364_v31, %v434_v40  ;;  %v1834_v63 = vunpack.c.l.b16 %v1735_v14 }
 0x62d   :  { %v1580_v57 = vpack.c.bf16 %v1572_v10, %v1572_v10  ;;  %v1581_v49 = vpack.c.bf16 %v1573_v3, %v1573_v3 }
 0x62e   :  { %v1835_v18 = vpack.c.b16 %v1834_v63, %v1833_v5 }
 0x62f   :  { %v1651_v2 = vunpack.c.l.b16 %v1580_v57  ;;  %v1652_v52 = vunpack.c.l.b16 %v1581_v49 }
 0x631   :  { %v3601_v28 = vpop.permute.xlu1 %1323  ;;  %v1653_v16 = vpack.c.b16 %v1652_v52, %v1651_v2  ;;  %v1329_v11 = vpop.permute.xlu0 %1328 }
 0x632   :  { %v1354_v31 = vmul.f32 %v1329_v11, %v3876_v60  ;;  %v2433_v11 = vld [vmem:[#allocation2 + $0x8] sm:$0xff] }
 0x633   :  { %v1658_v17 = vsel %vm646_vm10, %v1653_v16, 0 }
 0x634   :  { %1667 = vmatpush.bf16.xpose.msrb.mxu0 %v1658_v17 }
 0x63a   :  { %v1365_v36 = vpop.permute.xlu1 %1364 }
 0x63b   :  { %v1392_v35 = vmul.f32 %v1365_v36, %v443_v42 }
 0x63d   :  { %v2318_v26 = vpack.i.bf16 %v1392_v35, %v1391_v58 }
 0x63f   :  { %2319 = vrot.lane.b32.xlu0 %v2318_v26, %s2494_s9 }
 0x642   :  { %v2305_v32 = vpop.permute.xlu2 %2304 }
 0x643   :  { %v2279_v29 = vpop.permute.xlu1 %2278  ;;  %v2306_v59 = vunpack.i.l.bf16 %v2305_v32  ;;  %v2307_v8 = vunpack.i.h.bf16 %v2305_v32 }
 0x644   :  { %v2281_v37 = vunpack.i.h.bf16 %v2279_v29  ;;  %v2280_v30 = vunpack.i.l.bf16 %v2279_v29 }
 0x646   :  { %v1495_v54 = vmul.f32 %v2281_v37, %v3507_v23  ;;  %v1494_v44 = vmul.f32 %v2280_v30, %v3529_v55  ;;  %v1357_v23 = vmul.f32 %v1344_v43, %v3453_v1 }
 0x647   :  { %1836 = vrot.lane.b32.xlu0 %v1835_v18, %s2492_s17 }
 0x648   :  { %v1574_v22 = vsel %vm1431_vm1, %v1494_v44, %v2290_v15  ;;  %v1575_v46 = vsel %vm1431_vm1, %v1495_v54, %v2291_v19  ;;  %v1438_v55 = vsel %vm1431_vm1, %v1357_v23, %v2306_v59 }
 0x649   :  { %v1582_v51 = vpack.c.bf16 %v1574_v22, %v1574_v22  ;;  %v1583_v0 = vpack.c.bf16 %v1575_v46, %v1575_v46  ;;  %v1446_v3 = vpack.c.bf16 %v1438_v55, %v1438_v55 }
 0x64a   :  { %v3625_v33 = vpop.permute.xlu2 %1313 }
 0x64b   :  { %v1334_v45 = vpop.permute.xlu1 %1333  ;;  %v1681_v39 = vunpack.c.l.b16 %v1582_v51  ;;  %v1682_v13 = vunpack.c.l.b16 %v1583_v0  ;;  %v1676_v2 = vunpack.c.l.b16 %v1446_v3 }
 0x64c   :  { %v1355_v60 = vmul.f32 %v1334_v45, %v3877_v53 }
 0x64d   :  { %v1683_v48 = vpack.c.b16 %v1682_v13, %v1681_v39 }
 0x64f   :  { %v1688_v38 = vsel %vm646_vm10, %v1683_v48, 0 }
 0x650   :  { %1697 = vmatpush.bf16.xpose.msrb.mxu1 %v1688_v38 }
 0x652   :  { %v1777_v47 = vpop.permute.xlu2 %1776 }
 0x653   :  { %1789 = vmatpush.bf16.msra.mxu3 %v1777_v47  ;;  %v1349_v24 = vpop.permute.xlu1 %1348 }
 0x654   :  { %v1358_v10 = vmul.f32 %v1349_v24, %v3559_v6  ;;  %v1353_v6 = vmul.f32 %v3601_v28, %v3875_v61 }
 0x656   :  { %v1439_v57 = vsel %vm1431_vm1, %v1358_v10, %v2307_v8 }
 0x657   :  { %v1447_v49 = vpack.c.bf16 %v1439_v57, %v1439_v57 }
 0x659   :  { %v1677_v52 = vunpack.c.l.b16 %v1447_v49 }
 0x65a   :  { %v1747_v38 = vpop.permute.xlu2 %1746 }
 0x65b   :  { %v1678_v7 = vpack.c.b16 %v1677_v52, %v1676_v2  ;;  %v2310_v16 = vpop.permute.xlu1 %2309 }
 0x65c   :  { %v2312_v37 = vunpack.i.h.bf16 %v2310_v16  ;;  %v2311_v30 = vunpack.i.l.bf16 %v2310_v16  ;;  %v2432_v16 = vld [vmem:[#allocation2] sm:$0xff] }
 0x65d   :  { %2192 = vmatmul.msk.bf16.vlgmr.msrb.gmra.mxu1 %vm646_vm10, %v1678_v7 }
 0x65e   :  { %v1489_v44 = vmul.f32 %v2312_v37, %v3493_v27  ;;  %v1488_v53 = vmul.f32 %v2311_v30, %v3476_v21  ;;  %v1351_v21 = vmul.f32 %v3625_v33, %v3611_v9 }
 0x663   :  { %v1319_v1 = vpop.permute.xlu1 %1318 }
 0x664   :  { %v1352_v17 = vmul.f32 %v1319_v1, %v443_v42 }
 0x66b   :  { %v1807_v25 = vpop.permute.xlu1 %1806 }
 0x66c   :  { %1819 = vmatpush.bf16.msra.mxu0 %v1807_v25 }
 0x67a   :  { %v2295_v12 = vpop.permute.xlu0 %2294 }
 0x67b   :  { %v2297_v50 = vunpack.i.h.bf16 %v2295_v12  ;;  %v2296_v40 = vunpack.i.l.bf16 %v2295_v12 }
 0x67d   :  { %v1435_v43 = vsel %vm1431_vm1, %v1354_v31, %v2297_v50  ;;  %v1434_v36 = vsel %vm1431_vm1, %v1353_v6, %v2296_v40 }
 0x67e   :  { %v1443_v58 = vpack.c.bf16 %v1435_v43, %v1435_v43  ;;  %v1442_v35 = vpack.c.bf16 %v1434_v36, %v1434_v36 }
 0x680   :  { %v1617_v26 = vunpack.c.l.b16 %v1443_v58  ;;  %v1616_v4 = vunpack.c.l.b16 %v1442_v35 }
 0x682   :  { %v1618_v42 = vpack.c.b16 %v1617_v26, %v1616_v4  ;;  %v1339_v34 = vpop.permute.xlu0 %1338 }
 0x683   :  { %v1356_v14 = vmul.f32 %v1339_v34, %v3432_v20 }
 0x684   :  { %2190 = vmatmul.msk.bf16.vlgmr.msrb.gmra.mxu3 %vm646_vm10, %v1618_v42 }
 0x68a   :  { %v2300_v41 = vpop.permute.xlu0 %2299 }
 0x68b   :  { %v2302_v61 = vunpack.i.h.bf16 %v2300_v41  ;;  %v2301_v28 = vunpack.i.l.bf16 %v2300_v41 }
 0x68d   :  { %v1437_v5 = vsel %vm1431_vm1, %v1356_v14, %v2302_v61  ;;  %v1436_v32 = vsel %vm1431_vm1, %v1355_v60, %v2301_v28 }
 0x68e   :  { %v1445_v29 = vpack.c.bf16 %v1437_v5, %v1437_v5  ;;  %v1444_v63 = vpack.c.bf16 %v1436_v32, %v1436_v32 }
 0x690   :  { %v1647_v18 = vunpack.c.l.b16 %v1445_v29  ;;  %v1646_v19 = vunpack.c.l.b16 %v1444_v63 }
 0x692   :  { %v1648_v15 = vpack.c.b16 %v1647_v18, %v1646_v19  ;;  %v2315_v54 = vpop.permute.xlu0 %2314 }
 0x693   :  { %v2317_v22 = vunpack.i.h.bf16 %v2315_v54  ;;  %v2316_v20 = vunpack.i.l.bf16 %v2315_v54 }
 0x694   :  { %2191 = vmatmul.msk.bf16.vlgmr.msrb.gmra.mxu0 %vm646_vm10, %v1648_v15 }
 0x695   :  { %v1568_v46 = vsel %vm1431_vm1, %v1488_v53, %v2316_v20  ;;  %v1569_v51 = vsel %vm1431_vm1, %v1489_v44, %v2317_v22 }
 0x696   :  { %v1576_v0 = vpack.c.bf16 %v1568_v46, %v1568_v46  ;;  %v1577_v45 = vpack.c.bf16 %v1569_v51, %v1569_v51 }
 0x698   :  { %v1591_v39 = vunpack.c.l.b16 %v1576_v0  ;;  %v1592_v13 = vunpack.c.l.b16 %v1577_v45 }
 0x69a   :  { %v1593_v48 = vpack.c.b16 %v1592_v13, %v1591_v39 }
 0x69c   :  { %v1598_v59 = vsel %vm646_vm10, %v1593_v48, 0 }
 0x69d   :  { %1607 = vmatpush.bf16.xpose.msra.mxu2 %v1598_v59 }
 0x6a5   :  { %1759 = vmatpush.bf16.msrb.mxu2 %v1747_v38 }
 0x6b1   :  { %v2320_v27 = vpop.permute.xlu0 %2319 }
 0x6b2   :  { %v2322_v23 = vunpack.i.h.bf16 %v2320_v27  ;;  %v2321_v55 = vunpack.i.l.bf16 %v2320_v27 }
 0x6b4   :  { %v1432_v47 = vsel %vm1431_vm1, %v1351_v21, %v2321_v55  ;;  %v1433_v24 = vsel %vm1431_vm1, %v1352_v17, %v2322_v23 }
 0x6b5   :  { %v1440_v8 = vpack.c.bf16 %v1432_v47, %v1432_v47  ;;  %v1441_v10 = vpack.c.bf16 %v1433_v24, %v1433_v24 }
 0x6b7   :  { %v1586_v3 = vunpack.c.l.b16 %v1440_v8  ;;  %v1587_v57 = vunpack.c.l.b16 %v1441_v10 }
 0x6b9   :  { %v1588_v49 = vpack.c.b16 %v1587_v57, %v1586_v3  ;;  %v1837_v2 = vpop.permute.xlu0 %1836 }
 0x6ba   :  { %1849 = vmatpush.bf16.msra.mxu1 %v1837_v2 }
 0x6bb   :  { %2189 = vmatmul.msk.bf16.vlgmr.msra.gmra.mxu2 %vm646_vm10, %v1588_v49 }
 0x6da   :  { %v1699_v52 = vpop.f32.mrf.mxu1 }
 0x6db   :  { %v1710_v7 = vmul.f32 0.5, %v1699_v52  ;;  %v2502_v52 = vmov 8.0  }
 0x6dc   :  { %2412 = vrcp.f32 %v2502_v52 }
 0x6dd   :  { %v1718_v1 = vmul.f32 %v2432_v16, %v1710_v7 }
 0x6df   :  { %v1726_v25 = vpack.c.bf16 %v1718_v1, %v1718_v1 }
 0x6e1   :  { %v1828_v17 = vunpack.c.l.b16 %v1726_v25 }
 0x6e2   :  { %v1701_v9 = vpop.f32.mrf.mxu1  ;;  %v2413_v7 = vpop.eup %2412 }
 0x6e3   :  { %v1711_v33 = vmul.f32 0.5, %v1701_v9  ;;  %vm1885_vm11 = vweird.f32 %v2413_v7 }
 0x6e5   :  { %v1719_v12 = vmul.f32 %v2433_v11, %v1711_v33 }
 0x6e7   :  { %v1727_v31 = vpack.c.bf16 %v1719_v12, %v1719_v12 }
 0x6e9   :  { %v1829_v6 = vunpack.c.l.b16 %v1727_v31 }
 0x6eb   :  { %v1830_v50 = vpack.c.b16 %v1829_v6, %v1828_v17 }
 0x6ed   :  { %2196 = vmatmul.msk.bf16.vlgmr.msra.gmra.mxu1 %vm1052_vm14, %v1830_v50 }
 0x707   :  { %v1639_v40 = vpop.f32.mrf.mxu3 }
 0x708   :  { %v1706_v43 = vmul.f32 0.5, %v1639_v40 }
 0x70a   :  { %v1714_v36 = vmul.f32 %v2432_v16, %v1706_v43 }
 0x70c   :  { %v1722_v4 = vpack.c.bf16 %v1714_v36, %v1714_v36 }
 0x70e   :  { %v1768_v60 = vunpack.c.l.b16 %v1722_v4 }
 0x70f   :  { %v1641_v58 = vpop.f32.mrf.mxu3 }
 0x710   :  { %v1707_v35 = vmul.f32 0.5, %v1641_v58 }
 0x711   :  { %v1669_v26 = vpop.f32.mrf.mxu0 }
 0x712   :  { %v1715_v42 = vmul.f32 %v2433_v11, %v1707_v35  ;;  %v1708_v41 = vmul.f32 0.5, %v1669_v26 }
 0x714   :  { %v1723_v34 = vpack.c.bf16 %v1715_v42, %v1715_v42  ;;  %v1716_v28 = vmul.f32 %v2432_v16, %v1708_v41 }
 0x716   :  { %v1769_v14 = vunpack.c.l.b16 %v1723_v34  ;;  %v1724_v29 = vpack.c.bf16 %v1716_v28, %v1716_v28 }
 0x718   :  { %v1770_v61 = vpack.c.b16 %v1769_v14, %v1768_v60  ;;  %v1798_v30 = vunpack.c.l.b16 %v1724_v29 }
 0x719   :  { %v1671_v5 = vpop.f32.mrf.mxu0 }
 0x71a   :  { %v1709_v32 = vmul.f32 0.5, %v1671_v5  ;;  %2194 = vmatmul.msk.bf16.vlgmr.msra.gmra.mxu3 %vm1052_vm14, %v1770_v61 }
 0x71c   :  { %v1717_v63 = vmul.f32 %v2433_v11, %v1709_v32 }
 0x71e   :  { %v1725_v37 = vpack.c.bf16 %v1717_v63, %v1717_v63 }
 0x720   :  { %v1799_v18 = vunpack.c.l.b16 %v1725_v37 }
 0x722   :  { %v1800_v19 = vpack.c.b16 %v1799_v18, %v1798_v30 }
 0x724   :  { %2195 = vmatmul.msk.bf16.vlgmr.msra.gmra.mxu0 %vm1052_vm14, %v1800_v19 }
 0x73e   :  { %v1609_v15 = vpop.f32.mrf.mxu2 }
 0x73f   :  { %v1704_v54 = vmul.f32 0.5, %v1609_v15 }
 0x741   :  { %v1712_v44 = vmul.f32 %v2432_v16, %v1704_v54  ;;  %v1881_v16 = vmul.f32 8.0, %v2413_v7 }
 0x743   :  { %v1720_v20 = vpack.c.bf16 %v1712_v44, %v1712_v44  ;;  %v1882_v1 = vsub.f32 1.0, %v1881_v16 }
 0x745   :  { %v1738_v0 = vunpack.c.l.b16 %v1720_v20  ;;  %v1883_v9 = vmul.f32 %v2413_v7, %v1882_v1 }
 0x746   :  { %v1611_v53 = vpop.f32.mrf.mxu2 }
 0x747   :  { %v1705_v22 = vmul.f32 0.5, %v1611_v53  ;;  %v1884_v33 = vadd.f32 %v2413_v7, %v1883_v9 }
 0x749   :  { %v1713_v46 = vmul.f32 %v2433_v11, %v1705_v22  ;;  %v3666_v25 = vsel %vm1885_vm11, %v2413_v7, %v1884_v33 }
 0x74b   :  { %v1721_v51 = vpack.c.bf16 %v1713_v46, %v1713_v46 }
 0x74d   :  { %v1739_v45 = vunpack.c.l.b16 %v1721_v51 }
 0x74f   :  { %v1740_v39 = vpack.c.b16 %v1739_v45, %v1738_v0 }
 0x751   :  { %2193 = vmatmul.msk.bf16.vlgmr.msrb.gmra.mxu2 %vm1052_vm14, %v1740_v39 }
 0x76a   :  { %v1851_v13 = vpop.f32.mrf.mxu1 }
 0x76b   :  { %v1874_v10 = vsel %vm646_vm10, %v1851_v13, 0.0 }
 0x772   :  { %v1853_v55 = vpop.f32.mrf.mxu1 }
 0x773   :  { %v1877_v8 = vsel %vm646_vm10, %v1853_v55, 0.0 }
 0x79d   :  { %v1791_v48 = vpop.f32.mrf.mxu3 }
 0x79e   :  { %v1862_v59 = vsel %vm646_vm10, %v1791_v48, 0.0 }
 0x79f   :  { %1863 = vadd.xlane.f32.xlu1 %v1862_v59 }
 0x7a1   :  { %v1821_v38 = vpop.f32.mrf.mxu0 }
 0x7a2   :  { %v1868_v27 = vsel %vm646_vm10, %v1821_v38, 0.0 }
 0x7a3   :  { %1869 = vadd.xlane.f32.xlu2 %v1868_v27 }
 0x7a5   :  { %v1793_v21 = vpop.f32.mrf.mxu3 }
 0x7a6   :  { %v1865_v23 = vsel %vm646_vm10, %v1793_v21, 0.0 }
 0x7a7   :  { %1866 = vadd.xlane.f32.xlu0 %v1865_v23 }
 0x7a9   :  { %v1823_v47 = vpop.f32.mrf.mxu0 }
 0x7aa   :  { %v1871_v24 = vsel %vm646_vm10, %v1823_v47, 0.0 }
 0x7ab   :  { %1872 = vadd.xlane.f32.xlu1 %v1871_v24  ;;  %1878 = vadd.xlane.f32.xlu2 %v1877_v8 }
 0x7af   :  { %1875 = vadd.xlane.f32.xlu0 %v1874_v10 }
 0x7d4   :  { %v1761_v3 = vpop.f32.mrf.mxu2 }
 0x7d5   :  { %v1856_v57 = vsel %vm646_vm10, %v1761_v3, 0.0 }
 0x7d6   :  { %1857 = vadd.xlane.f32.xlu1 %v1856_v57 }
 0x7dc   :  { %v1763_v49 = vpop.f32.mrf.mxu2 }
 0x7dd   :  { %v1859_v2 = vsel %vm646_vm10, %v1763_v49, 0.0 }
 0x7de   :  { %1860 = vadd.xlane.f32.xlu0 %v1859_v2 }
 0x812   :  { %v1864_v11 = vpop.xlane.xlu1 %1863 }
 0x813   :  { %v1889_v12 = vmul.f32 %v3666_v25, %v1864_v11 }
 0x815   :  { %v3669_v31 = vsub.f32 %v1791_v48, %v1889_v12 }
 0x816   :  { %v1870_v17 = vpop.xlane.xlu2 %1869 }
 0x817   :  { %v1891_v6 = vmul.f32 %v3666_v25, %v1870_v17  ;;  %v1905_v50 = vmul.f32 %v3669_v31, %v3669_v31 }
 0x819   :  { %v3674_v40 = vsub.f32 %v1821_v38, %v1891_v6  ;;  %v1917_v43 = vsel %vm646_vm10, %v1905_v50, 0.0 }
 0x81a   :  { %v1867_v36 = vpop.xlane.xlu0 %1866  ;;  %1918 = vadd.xlane.f32.xlu2 %v1917_v43 }
 0x81b   :  { %v1890_v58 = vmul.f32 %v3666_v25, %v1867_v36  ;;  %v1907_v35 = vmul.f32 %v3674_v40, %v3674_v40 }
 0x81d   :  { %v3680_v26 = vsub.f32 %v1793_v21, %v1890_v58  ;;  %v1923_v4 = vsel %vm646_vm10, %v1907_v35, 0.0 }
 0x81e   :  { %v1873_v42 = vpop.xlane.xlu1 %1872  ;;  %1924 = vadd.xlane.f32.xlu0 %v1923_v4  ;;  %v1879_v34 = vpop.xlane.xlu2 %1878 }
 0x81f   :  { %v1892_v41 = vmul.f32 %v3666_v25, %v1873_v42  ;;  %v1894_v60 = vmul.f32 %v3666_v25, %v1879_v34  ;;  %v1906_v14 = vmul.f32 %v3680_v26, %v3680_v26 }
 0x821   :  { %v3687_v61 = vsub.f32 %v1823_v47, %v1892_v41  ;;  %v3689_v28 = vsub.f32 %v1853_v55, %v1894_v60  ;;  %v1920_v5 = vsel %vm646_vm10, %v1906_v14, 0.0 }
 0x822   :  { %1921 = vadd.xlane.f32.xlu1 %v1920_v5  ;;  %v1876_v32 = vpop.xlane.xlu0 %1875 }
 0x823   :  { %v1893_v29 = vmul.f32 %v3666_v25, %v1876_v32  ;;  %v1908_v63 = vmul.f32 %v3687_v61, %v3687_v61  ;;  %v1910_v37 = vmul.f32 %v3689_v28, %v3689_v28 }
 0x825   :  { %v3697_v30 = vsub.f32 %v1851_v13, %v1893_v29  ;;  %v1926_v18 = vsel %vm646_vm10, %v1908_v63, 0.0  ;;  %v1932_v19 = vsel %vm646_vm10, %v1910_v37, 0.0 }
 0x826   :  { %1927 = vadd.xlane.f32.xlu2 %v1926_v18  ;;  %1933 = vadd.xlane.f32.xlu0 %v1932_v19 }
 0x827   :  { %v1909_v15 = vmul.f32 %v3697_v30, %v3697_v30 }
 0x829   :  { %v1929_v54 = vsel %vm646_vm10, %v1909_v15, 0.0 }
 0x82a   :  { %1930 = vadd.xlane.f32.xlu1 %v1929_v54 }
 0x849   :  { %v1858_v44 = vpop.xlane.xlu1 %1857 }
 0x84a   :  { %v1887_v53 = vmul.f32 %v3666_v25, %v1858_v44 }
 0x84c   :  { %v3705_v22 = vsub.f32 %v1761_v3, %v1887_v53 }
 0x84e   :  { %v1903_v20 = vmul.f32 %v3705_v22, %v3705_v22 }
 0x850   :  { %v1911_v46 = vsel %vm646_vm10, %v1903_v20, 0.0 }
 0x851   :  { %v1861_v51 = vpop.xlane.xlu0 %1860  ;;  %1912 = vadd.xlane.f32.xlu2 %v1911_v46 }
 0x852   :  { %v1888_v0 = vmul.f32 %v3666_v25, %v1861_v51 }
 0x854   :  { %v3711_v45 = vsub.f32 %v1763_v49, %v1888_v0 }
 0x856   :  { %v1904_v39 = vmul.f32 %v3711_v45, %v3711_v45 }
 0x858   :  { %v1914_v13 = vsel %vm646_vm10, %v1904_v39, 0.0 }
 0x859   :  { %1915 = vadd.xlane.f32.xlu1 %v1914_v13 }
 0x88d   :  { %v1919_v48 = vpop.xlane.xlu2 %1918 }
 0x88e   :  { %v1937_v59 = vmul.f32 %v1919_v48, %v3666_v25 }
 0x890   :  { %v3718_v23 = vadd.f32 1e-05, %v1937_v59 }
 0x891   :  { %v1925_v38 = vpop.xlane.xlu0 %1924 }
 0x892   :  { %v1939_v27 = vmul.f32 %v1925_v38, %v3666_v25 }
 0x894   :  { %v1947_v21 = vadd.f32 1e-05, %v1939_v27 }
 0x895   :  { %v1922_v55 = vpop.xlane.xlu1 %1921 }
 0x896   :  { %2414 = vrsqrt.f32 %v1947_v21  ;;  %v1938_v47 = vmul.f32 %v1922_v55, %v3666_v25  ;;  %vm1997_vm13 = vweird.f32 %v1947_v21 }
 0x897   :  { %2416 = vrsqrt.f32 %v3718_v23 }
 0x898   :  { %v1946_v24 = vadd.f32 1e-05, %v1938_v47 }
 0x899   :  { %v1934_v8 = vpop.xlane.xlu0 %1933  ;;  %v1928_v10 = vpop.xlane.xlu2 %1927 }
 0x89a   :  { %2418 = vrsqrt.f32 %v1946_v24  ;;  %v1942_v3 = vmul.f32 %v1934_v8, %v3666_v25  ;;  %v1940_v57 = vmul.f32 %v1928_v10, %v3666_v25  ;;  %vm1987_vm4 = vweird.f32 %v1946_v24 }
 0x89c   :  { %v2415_v49 = vpop.eup %2414  ;;  %v1948_v2 = vadd.f32 1e-05, %v1940_v57  ;;  %v3724_v7 = vadd.f32 1e-05, %v1942_v3 }
 0x89d   :  { %v1992_v52 = vmul.f32 %v2415_v49, %v1947_v21  ;;  %v1931_v16 = vpop.xlane.xlu1 %1930  ;;  %v3727_v9 = vpop.eup %2416  ;;  %vm1998_vm0 = vweird.f32 %v2415_v49 }
 0x89e   :  { %v1941_v1 = vmul.f32 %v1931_v16, %v3666_v25  ;;  %2420 = vrsqrt.f32 %v1948_v2  ;;  %v1972_v50 = vmul.f32 %v3727_v9, %v3718_v23  ;;  %vm1999_vm2 = vmor %vm1997_vm13, %vm1998_vm0  ;;  %vm2007_vm7 = vweird.f32 %v1948_v2 }
 0x89f   :  { %v1993_v33 = vmul.f32 %v2415_v49, %v1992_v52  ;;  %2422 = vrsqrt.f32 %v3724_v7  ;;  %vm1978_vm1 = vweird.f32 %v3727_v9  ;;  %vm1977_vm0 = vweird.f32 %v3718_v23 }
 0x8a0   :  { %v2419_v11 = vpop.eup %2418  ;;  %v1949_v12 = vadd.f32 1e-05, %v1941_v1  ;;  %v1973_v42 = vmul.f32 %v3727_v9, %v1972_v50  ;;  %vm1979_vm13 = vmor %vm1977_vm0, %vm1978_vm1 }
 0x8a1   :  { %v1994_v17 = vmul.f32 0.5, %v1993_v33  ;;  %v1982_v6 = vmul.f32 %v2419_v11, %v1946_v24  ;;  %vm1988_vm15 = vweird.f32 %v2419_v11 }
 0x8a2   :  { %2424 = vrsqrt.f32 %v1949_v12  ;;  %v1974_v18 = vmul.f32 0.5, %v1973_v42  ;;  %vm1989_vm8 = vmor %vm1987_vm4, %vm1988_vm15  ;;  %vm2017_vm12 = vweird.f32 %v1949_v12  ;;  %vm2027_vm15 = vweird.f32 %v3724_v7 }
 0x8a3   :  { %v1995_v43 = vsub.f32 1.5, %v1994_v17  ;;  %v1983_v36 = vmul.f32 %v2419_v11, %v1982_v6 }
 0x8a4   :  { %v2421_v58 = vpop.eup %2420  ;;  %v1975_v51 = vsub.f32 1.5, %v1974_v18 }
 0x8a5   :  { %v1996_v35 = vmul.f32 %v2415_v49, %v1995_v43  ;;  %v1984_v4 = vmul.f32 0.5, %v1983_v36  ;;  %v2002_v34 = vmul.f32 %v2421_v58, %v1948_v2  ;;  %v2423_v41 = vpop.eup %2422  ;;  %vm2008_vm5 = vweird.f32 %v2421_v58 }
 0x8a6   :  { %v2022_v19 = vmul.f32 %v2423_v41, %v3724_v7  ;;  %vm2009_vm3 = vmor %vm2007_vm7, %vm2008_vm5 }
 0x8a7   :  { %v1985_v60 = vsub.f32 1.5, %v1984_v4  ;;  %v2000_v14 = vsel %vm1999_vm2, %v2415_v49, %v1996_v35  ;;  %v2003_v32 = vmul.f32 %v2421_v58, %v2002_v34  ;;  %vm2028_vm2 = vweird.f32 %v2423_v41 }
 0x8a8   :  { %v2425_v5 = vpop.eup %2424  ;;  %v2035_v29 = vmul.f32 %v2000_v14, %v3674_v40  ;;  %v2023_v0 = vmul.f32 %v2423_v41, %v2022_v19  ;;  %vm2029_vm4 = vmor %vm2027_vm15, %vm2028_vm2 }
 0x8a9   :  { %v2012_v63 = vmul.f32 %v2425_v5, %v1949_v12  ;;  %v1986_v37 = vmul.f32 %v2419_v11, %v1985_v60  ;;  %v2004_v15 = vmul.f32 0.5, %v2003_v32  ;;  %vm2018_vm6 = vweird.f32 %v2425_v5 }
 0x8aa   :  { %2049 = vrot.lane.b32.xlu1 %v2035_v29, %s2503_s5  ;;  %v2024_v38 = vmul.f32 0.5, %v2023_v0  ;;  %vm2019_vm11 = vmor %vm2017_vm12, %vm2018_vm6  ;;  %vm2067_vm12 = vcmask 195584  }
 0x8ab   :  { %v2013_v54 = vmul.f32 %v2425_v5, %v2012_v63  ;;  %v1990_v44 = vsel %vm1989_vm8, %v2419_v11, %v1986_v37  ;;  %v2005_v53 = vsub.f32 1.5, %v2004_v15  ;;  %v2209_v63 = vld [vmem:[%s3775_s3 + $0x8] sm:$0xff]  ;;  %v2208_v37 = vld [vmem:[%s3775_s3] sm:$0xff]  ;;  %s2125_s3 = sshll.u32 %s3779_s7, 4  ;;  %s2126_s3 = int_to_ptr.hbm [resolvable:$true] %s2125_s3 }
 0x8ac   :  { %v2034_v20 = vmul.f32 %v1990_v44, %v3680_v26  ;;  %v1976_v26 = vmul.f32 %v3727_v9, %v1975_v51  ;;  %v2025_v55 = vsub.f32 1.5, %v2024_v38  ;;  %2109 = vmatpush.bf16.msra.mxu2 %v2209_v63 }
 0x8ad   :  { %v2014_v46 = vmul.f32 0.5, %v2013_v54  ;;  %v2006_v40 = vmul.f32 %v2421_v58, %v2005_v53 }
 0x8ae   :  { %2043 = vrot.lane.b32.xlu2 %v2034_v20, %s2488_s30  ;;  %v1980_v47 = vsel %vm1979_vm13, %v3727_v9, %v1976_v26  ;;  %v2026_v24 = vmul.f32 %v2423_v41, %v2025_v55 }
 0x8af   :  { %v2015_v39 = vsub.f32 1.5, %v2014_v46  ;;  %v2010_v13 = vsel %vm2009_vm3, %v2421_v58, %v2006_v40 }
 0x8b0   :  { %v2036_v59 = vmul.f32 %v2010_v13, %v3687_v61  ;;  %v2033_v61 = vmul.f32 %v1980_v47, %v3669_v31  ;;  %v2030_v8 = vsel %vm2029_vm4, %v2423_v41, %v2026_v24  ;;  %2110 = vmatpush.bf16.msra.mxu2 %v2208_v37 }
 0x8b1   :  { %v2016_v48 = vmul.f32 %v2425_v5, %v2015_v39  ;;  %v2038_v23 = vmul.f32 %v2030_v8, %v3689_v28 }
 0x8b2   :  { %2051 = vrot.lane.b32.xlu0 %v2036_v59, %s2503_s5 }
 0x8b3   :  { %v2020_v27 = vsel %vm2019_vm11, %v2425_v5, %v2016_v48 }
 0x8b4   :  { %v2037_v21 = vmul.f32 %v2020_v27, %v3697_v30 }
 0x8b6   :  { %2057 = vrot.lane.b32.xlu2 %v2037_v21, %s2504_s16 }
 0x8ba   :  { %2041 = vrot.lane.b32.xlu0 %v2033_v61, %s2488_s30 }
 0x8c2   :  { %2059 = vrot.lane.b32.xlu0 %v2038_v23, %s2504_s16 }
 0x8c4   :  { %v1913_v30 = vpop.xlane.xlu2 %1912 }
 0x8c5   :  { %v1935_v10 = vmul.f32 %v1913_v30, %v3666_v25 }
 0x8c7   :  { %v1943_v57 = vadd.f32 1e-05, %v1935_v10 }
 0x8c9   :  { %2426 = vrsqrt.f32 %v1943_v57  ;;  %vm1957_vm5 = vweird.f32 %v1943_v57 }
 0x8cc   :  { %v1916_v3 = vpop.xlane.xlu1 %1915 }
 0x8cd   :  { %v1936_v49 = vmul.f32 %v1916_v3, %v3666_v25 }
 0x8cf   :  { %v1944_v31 = vadd.f32 1e-05, %v1936_v49  ;;  %v2427_v2 = vpop.eup %2426 }
 0x8d0   :  { %v1952_v52 = vmul.f32 %v2427_v2, %v1943_v57  ;;  %vm1958_vm8 = vweird.f32 %v2427_v2 }
 0x8d1   :  { %2428 = vrsqrt.f32 %v1944_v31  ;;  %vm1959_vm7 = vmor %vm1957_vm5, %vm1958_vm8  ;;  %vm1967_vm6 = vweird.f32 %v1944_v31 }
 0x8d2   :  { %v1953_v1 = vmul.f32 %v2427_v2, %v1952_v52 }
 0x8d4   :  { %v1954_v9 = vmul.f32 0.5, %v1953_v1 }
 0x8d6   :  { %v1955_v11 = vsub.f32 1.5, %v1954_v9 }
 0x8d7   :  { %v2429_v16 = vpop.eup %2428 }
 0x8d8   :  { %v1962_v7 = vmul.f32 %v2429_v16, %v1944_v31  ;;  %v1956_v12 = vmul.f32 %v2427_v2, %v1955_v11  ;;  %vm1968_vm3 = vweird.f32 %v2429_v16 }
 0x8d9   :  { %vm1969_vm1 = vmor %vm1967_vm6, %vm1968_vm3 }
 0x8da   :  { %v1963_v33 = vmul.f32 %v2429_v16, %v1962_v7  ;;  %v1960_v25 = vsel %vm1959_vm7, %v2427_v2, %v1956_v12 }
 0x8db   :  { %v2031_v36 = vmul.f32 %v1960_v25, %v3705_v22 }
 0x8dc   :  { %v1964_v28 = vmul.f32 0.5, %v1963_v33 }
 0x8de   :  { %v1965_v50 = vsub.f32 1.5, %v1964_v28 }
 0x8e0   :  { %v1966_v43 = vmul.f32 %v2429_v16, %v1965_v50 }
 0x8e2   :  { %v1970_v42 = vsel %vm1969_vm1, %v2429_v16, %v1966_v43 }
 0x8e3   :  { %v2032_v14 = vmul.f32 %v1970_v42, %v3711_v45 }
 0x908   :  { %v2044_v17 = vpop.permute.xlu2 %2043 }
 0x909   :  { %v2064_v5 = vsel %vm646_vm10, %v2032_v14, %v2044_v17 }
 0x910   :  { %v2058_v34 = vpop.permute.xlu2 %2057 }
 0x91c   :  { %v2050_v35 = vpop.permute.xlu1 %2049 }
 0x924   :  { %v2052_v6 = vpop.permute.xlu0 %2051 }
 0x925   :  { %v2066_v22 = vsel %vm1052_vm14, %v2064_v5, %v2052_v6 }
 0x92c   :  { %v2042_v58 = vpop.permute.xlu0 %2041 }
 0x92d   :  { %v2063_v4 = vsel %vm646_vm10, %v2031_v36, %v2042_v58 }
 0x92e   :  { %v2065_v41 = vsel %vm1052_vm14, %v2063_v4, %v2050_v35 }
 0x92f   :  { %v2068_v60 = vsel %vm2067_vm12, %v2065_v41, %v2058_v34 }
 0x930   :  { %2072 = vrot.lane.b32.xlu1 %v2068_v60, %s2505_s0 }
 0x934   :  { %v2060_v32 = vpop.permute.xlu0 %2059 }
 0x935   :  { %v2069_v29 = vsel %vm2067_vm12, %v2066_v22, %v2060_v32 }
 0x936   :  { %2074 = vrot.lane.b32.xlu2 %v2069_v29, %s2505_s0 }
 0x990   :  { %v2075_v18 = vpop.permute.xlu2 %2074 }
 0x991   :  { %v2079_v45 = vmul.f32 %v2075_v18, %v3485_v56 }
 0x9a2   :  { %v2073_v19 = vpop.permute.xlu1 %2072 }
 0x9a3   :  { %v2078_v15 = vmul.f32 %v2073_v19, %v3206_v62 }
 0x9a5   :  { %v2080_v54 = vpack.c.bf16 %v2079_v45, %v2078_v15 }
 0x9a7   :  { %2086 = vrot.lane.b32.xlu0 %v2080_v54, %s2505_s0 }
 0xa19   :  { %v2087_v44 = vpop.permute.xlu0 %2086 }
 0xa1a   :  { %2205 = vmatmul.msk.bf16.vlgmr.msra.gmra.mxu2 %vm123_vm9, %v2087_v44 }
 0xa9d   :  { %v2112_v53 = vpop.f32.mrf.mxu2 }
 0xa9e   :  { %2117 = vst.msk [vmem:[#allocation5] sm:$0xff] %vm123_vm9, %v2112_v53 }
 0xaa5   :  { %v2114_v20 = vpop.f32.mrf.mxu2 }
 0xaa6   :  { %2118 = vst.msk [vmem:[#allocation5 + $0x8] sm:$0xff] %vm123_vm9, %v2114_v20 }
 0xaa7   :  { %2131 = dma.vmem_to_hbm [thread:$0]  %s2124_s20, 256, %s2126_s3, [#allocation4], %s2487_s29, %s2487_s29, %s2488_s30  }
 0xaa8   :  { %2484 = dma.done.wait [#allocation4], 256  }
 0xaa9   :  { %2485 = vsyncadd [#allocation4], 4294967040 }
 0xaaa   :  { %2136 = vsyncpa [#allocation3], 1 }
 0xaab   :  { %2137 = vsyncpa [#allocation4], 1 }

</bundles_post_ra>
